<compile_context>
chip_gen: v6e
topology: v6e:2x2x1
jax: 0.10.0
libtpu: 0.0.40
codegen_flags: <defaults>
</compile_context>

<pallas_src>
import jax
import jax.numpy as jnp
from jax.experimental import pallas as pl
from jax.experimental.pallas import tpu as pltpu

EPS = 1e-5
LANES = 128


# ----------------------------- Pallas kernel ------------------------------- #

def _bottleneck_kernel(x_ref, x_top_ref, x_bot_ref,
                       w1_ref, b1_ref, w2_ref, b2_ref, w3_ref, b3_ref, o_ref):
    _, TH, W, Cp = x_ref.shape
    Pp = w1_ref.shape[1]
    C4p = w3_ref.shape[1]
    t = pl.program_id(1)
    t_last = pl.num_programs(1) - 1

    # ---- conv1 (1x1) + folded BN + ReLU on the tile plus a 1-row halo above/below.
    x_ext = jnp.concatenate([x_top_ref[0], x_ref[0], x_bot_ref[0]], axis=0)  # (TH+2, W, Cp)
    h1 = jnp.dot(x_ext.reshape((TH + 2) * W, Cp), w1_ref[...],
                 preferred_element_type=jnp.float32)
    h1 = jnp.maximum(h1 + b1_ref[...], 0.0).reshape(TH + 2, W, Pp)

    # PyTorch zero-pads h1 (post conv1+BN+ReLU) at the image boundary; halo rows that
    # fall outside the image (fetched with clamped row indices) must be zeroed here.
    row = jax.lax.broadcasted_iota(jnp.int32, (TH + 2, 1, 1), 0)
    inside = jnp.logical_and(jnp.logical_or(t > 0, row > 0),
                             jnp.logical_or(t < t_last, row < TH + 1))
    h1 = jnp.where(inside, h1, 0.0).astype(jnp.bfloat16)

    # ---- conv2 (3x3, padding=1): per row offset, one (TH*W, 3*Pp) slab (the three
    # column-shifted views concatenated on the lane axis) -> 3 K=3*Pp bf16 matmuls.
    zcol = jnp.zeros((TH + 2, 1, Pp), jnp.bfloat16)
    h1p = jnp.concatenate([zcol, h1, zcol], axis=1)                  # (TH+2, W+2, Pp)
    acc = None
    for di in range(3):
        slab = jnp.concatenate(
            [h1p[di:di + TH, 0:W], h1p[di:di + TH, 1:W + 1], h1p[di:di + TH, 2:W + 2]],
            axis=-1).reshape(TH * W, 3 * Pp)
        part = jnp.dot(slab, w2_ref[di], preferred_element_type=jnp.float32)
        acc = part if acc is None else acc + part
    h2 = jnp.maximum(acc + b2_ref[...], 0.0).astype(jnp.bfloat16)    # (TH*W, Pp)

    # ---- conv3 (1x1) + folded BN + residual add + ReLU, bf16 store.
    out = jnp.dot(h2, w3_ref[...], preferred_element_type=jnp.float32) + b3_ref[...]
    res = x_ref[0].astype(jnp.float32).reshape(TH * W, C4p)          # stride=1 residual
    o_ref[...] = jnp.maximum(out + res, 0.0).reshape(1, TH, W, C4p).astype(o_ref.dtype)


# ------------------------------- JAX glue ---------------------------------- #

def _round_up(x, m):
    return ((x + m - 1) // m) * m


def _fold_bn(bn_params):
    gamma, beta, mean, var = bn_params
    scale = gamma / jnp.sqrt(var + EPS)
    bias = beta - mean * scale
    return scale.astype(jnp.float32), bias.astype(jnp.float32)


def _gen_vmem_config():
    """(per-step VMEM budget, vmem_limit_bytes) per TPU generation, safe fallback."""
    kind = ""
    try:
        kind = jax.devices()[0].device_kind.lower()
    except Exception:
        pass
    if "v7" in kind:                     # v7x: 64 MiB physical VMEM per TensorCore
        return 28 * 1024 * 1024, 48 * 1024 * 1024
    if "v5" in kind or "v6" in kind:     # v5e/v6e: 128 MiB physical VMEM
        return 40 * 1024 * 1024, 80 * 1024 * 1024
    return 12 * 1024 * 1024, 32 * 1024 * 1024   # unknown backend: conservative


def _estimate_vmem_bytes(TH, W, Cp, Pp, C4p):
    """Per-grid-step VMEM: double-buffered streamed blocks + weight blocks
    (double-buffered even though constant-index) + in-kernel intermediates."""
    stream = 2 * (TH * W * Cp * 2 + 2 * W * Cp * 2 + TH * W * C4p * 2)
    weights = 2 * ((Cp * Pp + 9 * Pp * Pp + Pp * C4p) * 2 + (2 * Pp + C4p) * 4)
    ext = (TH + 2) * W
    inter = (ext * Cp * 2                    # x_ext (bf16)
             + ext * Pp * 6                  # h1 f32 + bf16 copy
             + (TH + 2) * (W + 2) * Pp * 2   # h1p (bf16)
             + TH * W * (3 * Pp * 2          # tap slab (bf16)
                         + Pp * 4            # conv2 accumulator (f32)
                         + C4p * 8))         # conv3 out + residual (f32)
    return stream + weights + inter


def _pick_tile_rows(H, W, Cp, Pp, C4p, budget_bytes):
    best = 1
    for d in range(1, H + 1):
        if H % d == 0 and _estimate_vmem_bytes(d, W, Cp, Pp, C4p) <= budget_bytes:
            best = d
    return best


def bottleneck_forward(x_nchw, params, stride=1, tile_rows=None):
    """Pallas-backed Bottleneck forward. Input/output are NCHW (PyTorch layout)."""
    assert stride == 1, "TODO(synk): stride != 1 not implemented"
    x = jnp.transpose(x_nchw, (0, 2, 3, 1)).astype(jnp.float32)      # NHWC
    N, H, W, Cin = x.shape

    P = params["conv1"].shape[0]
    C4 = params["conv3"].shape[0]
    assert C4 == 4 * P and Cin == C4, "TODO(synk): downsample branch not implemented"

    # Pad every channel dim to a multiple of 128 -> lane-dense matmuls and stores.
    Cp = _round_up(Cin, LANES)
    Pp = _round_up(P, LANES)
    C4p = _round_up(C4, LANES)
    assert Cp == C4p  # needed for the raw residual add

    # ---- Fold BN scale into weight columns, pad channels, cast weights to bf16.
    s1, b1 = _fold_bn(params["bn1"])
    w1 = params["conv1"].reshape(P, Cin).T * s1[None, :]             # (Cin, P)
    w1p = jnp.zeros((Cp, Pp), jnp.float32).at[:Cin, :P].set(w1).astype(jnp.bfloat16)
    b1p = jnp.zeros((1, Pp), jnp.float32).at[0, :P].set(b1)

    s2, b2 = _fold_bn(params["bn2"])
    w2 = jnp.transpose(params["conv2"], (2, 3, 1, 0)) * s2[None, None, None, :]  # (3,3,in,out)
    w2p = jnp.zeros((3, 3, Pp, Pp), jnp.float32).at[:, :, :P, :P].set(w2)
    w2p = w2p.reshape(3, 3 * Pp, Pp).astype(jnp.bfloat16)            # per-row-offset slab weights
    b2p = jnp.zeros((1, Pp), jnp.float32).at[0, :P].set(b2)

    s3, b3 = _fold_bn(params["bn3"])
    w3 = params["conv3"].reshape(C4, P).T * s3[None, :]              # (P, C4)
    w3p = jnp.zeros((Pp, C4p), jnp.float32).at[:P, :C4].set(w3).astype(jnp.bfloat16)
    b3p = jnp.zeros((1, C4p), jnp.float32).at[0, :C4].set(b3)

    # ---- Single bf16, channel-padded activation copy (no row-padded duplicate).
    xc = jnp.zeros((N, H, W, Cp), jnp.bfloat16).at[..., :Cin].set(x.astype(jnp.bfloat16))

    budget, vmem_limit = _gen_vmem_config()
    TH = tile_rows if tile_rows is not None else _pick_tile_rows(H, W, Cp, Pp, C4p, budget)
    assert H % TH == 0, "tile_rows must divide H"
    # Give both v7x TensorCores work: ensure the parallel grid has >= 2 steps.
    if tile_rows is None and N * (H // TH) < 2:
        for d in range(TH - 1, 0, -1):
            if H % d == 0:
                TH = d
                break
    grid = (N, H // TH)

    flops = 2 * N * H * W * (Cp * Pp + 9 * Pp * Pp + Pp * C4p)
    bytes_accessed = int(
        N * H * W * Cp * 2                      # x body tiles (bf16)
        + 2 * N * (H // TH) * W * Cp * 2        # halo rows (bf16)
        + N * H * W * C4p * 2                   # output (bf16)
        + (Cp * Pp + 9 * Pp * Pp + Pp * C4p) * 2
        + (2 * Pp + C4p) * 4)

    out_p = pl.pallas_call(
        _bottleneck_kernel,
        out_shape=jax.ShapeDtypeStruct((N, H, W, C4p), jnp.bfloat16),
        grid_spec=pltpu.PrefetchScalarGridSpec(
            num_scalar_prefetch=0,
            grid=grid,
            in_specs=[
                # center rows of x (also the residual)
                pl.BlockSpec((1, TH, W, Cp), lambda n, t: (n, t, 0, 0)),
                # 1-row halo above / below, clamped to the image; rows that fall
                # outside the image are zero-masked in-kernel after conv1+BN+ReLU.
                pl.BlockSpec((1, 1, W, Cp),
                             lambda n, t: (n, jnp.maximum(t * TH - 1, 0), 0, 0)),
                pl.BlockSpec((1, 1, W, Cp),
                             lambda n, t: (n, jnp.minimum(t * TH + TH, H - 1), 0, 0)),
                # weights / folded-BN biases (constant blocks -> fetched once)
                pl.BlockSpec((Cp, Pp), lambda n, t: (0, 0)),
                pl.BlockSpec((1, Pp), lambda n, t: (0, 0)),
                pl.BlockSpec((3, 3 * Pp, Pp), lambda n, t: (0, 0, 0)),
                pl.BlockSpec((1, Pp), lambda n, t: (0, 0)),
                pl.BlockSpec((Pp, C4p), lambda n, t: (0, 0)),
                pl.BlockSpec((1, C4p), lambda n, t: (0, 0)),
            ],
            out_specs=pl.BlockSpec((1, TH, W, C4p), lambda n, t: (n, t, 0, 0)),
        ),
        compiler_params=pltpu.CompilerParams(
            dimension_semantics=("parallel", "parallel"),
            vmem_limit_bytes=vmem_limit),
        cost_estimate=pl.CostEstimate(
            flops=flops, transcendentals=0, bytes_accessed=bytes_accessed),
    )(xc, xc, xc, w1p, b1p, w2p, b2p, w3p, b3p)

    out = out_p[..., :C4].astype(jnp.float32)    # drop channel padding
    return jnp.transpose(out, (0, 3, 1, 2))      # back to NCHW


# ----------------------- pure-JAX reference (checking) ---------------------- #

def _conv_ref(x_nhwc, w_oihw, stride, padding):
    return jax.lax.conv_general_dilated(
        x_nhwc, jnp.transpose(w_oihw, (2, 3, 1, 0)),
        window_strides=(stride, stride),
        padding=[(padding, padding), (padding, padding)],
        dimension_numbers=("NHWC", "HWIO", "NHWC"))


def bottleneck_ref(x_nchw, params, stride=1):
    x = jnp.transpose(x_nchw, (0, 2, 3, 1)).astype(jnp.float32)

    def bn(h, p):
        g, b, m, v = p
        return (h - m) / jnp.sqrt(v + EPS) * g + b

    h = jax.nn.relu(bn(_conv_ref(x, params["conv1"], 1, 0), params["bn1"]))
    h = jax.nn.relu(bn(_conv_ref(h, params["conv2"], stride, 1), params["bn2"]))
    h = bn(_conv_ref(h, params["conv3"], 1, 0), params["bn3"])
    h = jax.nn.relu(h + x)
    return jnp.transpose(h, (0, 3, 1, 2))


# ---------------------------------- main ------------------------------------ #

def make_params(key, inplanes, planes):
    ks = jax.random.split(key, 16)

    def bn_params(k, c):
        k1, k2, k3, k4 = jax.random.split(k, 4)
        gamma = jax.random.uniform(k1, (c,), jnp.float32, 0.8, 1.2)
        beta = 0.1 * jax.random.normal(k2, (c,), jnp.float32)
        mean = 0.1 * jax.random.normal(k3, (c,), jnp.float32)
        var = jax.random.uniform(k4, (c,), jnp.float32, 0.5, 1.5)
        return (gamma, beta, mean, var)

    return {
        "conv1": 0.2 * jax.random.normal(ks[0], (planes, inplanes, 1, 1), jnp.float32),
        "bn1": bn_params(ks[1], planes),
        "conv2": 0.2 * jax.random.normal(ks[2], (planes, planes, 3, 3), jnp.float32),
        "bn2": bn_params(ks[3], planes),
        "conv3": 0.2 * jax.random.normal(ks[4], (planes * 4, planes, 1, 1), jnp.float32),
        "bn3": bn_params(ks[5], planes * 4),
    }


if __name__ == "__main__":
    key = jax.random.PRNGKey(0)
    kx, kp = jax.random.split(key)

    inplanes, planes = 16, 4        # expansion=4 -> output channels = 16 = inplanes
    N, H, W = 2, 16, 16
    x = jax.random.normal(kx, (N, inplanes, H, W), jnp.float32)   # NCHW input

    params = make_params(kp, inplanes, planes)

    ref = jax.block_until_ready(bottleneck_ref(x, params, stride=1))

    # Run with an explicit 8-row tile (exercises the cross-tile halo / boundary-mask
    # path) and with the auto-picked tile size.  The whole pipeline (inputs,
    # intermediates and the output store) is bf16 on the MXU with f32 accumulation,
    # so compare with bf16-end-to-end tolerances.
    for tr in (8, None):
        out = jax.block_until_ready(bottleneck_forward(x, params, stride=1, tile_rows=tr))
        assert out.shape == (N, planes * 4, H, W)
        err = jnp.abs(out - ref)
        tol = 3e-2 + 3e-2 * jnp.abs(ref)
        assert bool(jnp.all(err <= tol)), (
            f"mismatch vs reference (tile_rows={tr}): max abs err {float(jnp.max(err))}")

    print("KERNEL_OK")
</pallas_src>

<mosaic_0001>
module attributes {stable_mosaic.version = 11 : i64} {
  func.func @_bottleneck_kernel(%arg0: i32, %arg1: i32, %arg2: memref<1x8x16x128xbf16, #tpu.memory_space<vmem>>, %arg3: memref<1x1x16x128xbf16, #tpu.memory_space<vmem>>, %arg4: memref<1x1x16x128xbf16, #tpu.memory_space<vmem>>, %arg5: memref<128x128xbf16, #tpu.memory_space<vmem>>, %arg6: memref<1x128xf32, #tpu.memory_space<vmem>>, %arg7: memref<3x384x128xbf16, #tpu.memory_space<vmem>>, %arg8: memref<1x128xf32, #tpu.memory_space<vmem>>, %arg9: memref<128x128xbf16, #tpu.memory_space<vmem>>, %arg10: memref<1x128xf32, #tpu.memory_space<vmem>>, %arg11: memref<1x8x16x128xbf16, #tpu.memory_space<vmem>>) attributes {dimension_semantics = [#tpu.dimension_semantics<parallel>, #tpu.dimension_semantics<parallel>], iteration_bounds = array<i64: 2, 2>, scalar_prefetch = 0 : i64, scratch_operands = 0 : i64, tpu.core_type = #tpu.core_type<tc>, window_params = [{transform_indices = @transform_0, window_bounds = array<i64: 1, 8, 16, 128>}, {transform_indices = @transform_1, window_bounds = array<i64: 1, 1, 16, 128>}, {transform_indices = @transform_2, window_bounds = array<i64: 1, 1, 16, 128>}, {pipeline_mode = #tpu.pipeline_mode<synchronous>, transform_indices = @transform_3, window_bounds = array<i64: 128, 128>}, {pipeline_mode = #tpu.pipeline_mode<synchronous>, transform_indices = @transform_4, window_bounds = array<i64: 1, 128>}, {pipeline_mode = #tpu.pipeline_mode<synchronous>, transform_indices = @transform_5, window_bounds = array<i64: 3, 384, 128>}, {pipeline_mode = #tpu.pipeline_mode<synchronous>, transform_indices = @transform_6, window_bounds = array<i64: 1, 128>}, {pipeline_mode = #tpu.pipeline_mode<synchronous>, transform_indices = @transform_7, window_bounds = array<i64: 128, 128>}, {pipeline_mode = #tpu.pipeline_mode<synchronous>, transform_indices = @transform_8, window_bounds = array<i64: 1, 128>}, {transform_indices = @transform_9, window_bounds = array<i64: 1, 8, 16, 128>}]} {
    %c0 = arith.constant 0 : index
    %c0_0 = arith.constant 0 : index
    %c0_1 = arith.constant 0 : index
    %c0_2 = arith.constant 0 : index
    %0 = vector.load %arg3[%c0, %c0_0, %c0_1, %c0_2] : memref<1x1x16x128xbf16, #tpu.memory_space<vmem>>, vector<1x1x16x128xbf16>
    %1 = vector.shape_cast %0 : vector<1x1x16x128xbf16> to vector<1x16x128xbf16>
    %c0_3 = arith.constant 0 : index
    %c0_4 = arith.constant 0 : index
    %c0_5 = arith.constant 0 : index
    %c0_6 = arith.constant 0 : index
    %2 = vector.load %arg2[%c0_3, %c0_4, %c0_5, %c0_6] : memref<1x8x16x128xbf16, #tpu.memory_space<vmem>>, vector<1x8x16x128xbf16>
    %3 = vector.shape_cast %2 : vector<1x8x16x128xbf16> to vector<8x16x128xbf16>
    %c0_7 = arith.constant 0 : index
    %c0_8 = arith.constant 0 : index
    %c0_9 = arith.constant 0 : index
    %c0_10 = arith.constant 0 : index
    %4 = vector.load %arg4[%c0_7, %c0_8, %c0_9, %c0_10] : memref<1x1x16x128xbf16, #tpu.memory_space<vmem>>, vector<1x1x16x128xbf16>
    %5 = vector.shape_cast %4 : vector<1x1x16x128xbf16> to vector<1x16x128xbf16>
    %6 = tpu.concatenate %1, %3, %5 in 0 : vector<1x16x128xbf16>, vector<8x16x128xbf16>, vector<1x16x128xbf16> -> vector<10x16x128xbf16>
    %7 = vector.shape_cast %6 : vector<10x16x128xbf16> to vector<160x128xbf16>
    %c0_11 = arith.constant 0 : index
    %c0_12 = arith.constant 0 : index
    %8 = vector.load %arg5[%c0_11, %c0_12] : memref<128x128xbf16, #tpu.memory_space<vmem>>, vector<128x128xbf16>
    %cst = arith.constant dense<0.000000e+00> : vector<160x128xf32>
    %9 = tpu.matmul %7, %8, %cst {dimension_numbers = #tpu.dot_dimension_numbers<[1], [0], [0], [1], [0, 0, 1, 1], [], []>} : vector<160x128xbf16>, vector<128x128xbf16>, vector<160x128xf32> -> vector<160x128xf32>
    %c0_13 = arith.constant 0 : index
    %c0_14 = arith.constant 0 : index
    %10 = vector.load %arg6[%c0_13, %c0_14] : memref<1x128xf32, #tpu.memory_space<vmem>>, vector<1x128xf32>
    %11 = vector.broadcast %10 : vector<1x128xf32> to vector<160x128xf32>
    %12 = arith.addf %9, %11 : vector<160x128xf32>
    %cst_15 = arith.constant 0.000000e+00 : f32
    %13 = vector.broadcast %cst_15 : f32 to vector<160x128xf32>
    %14 = arith.maximumf %12, %13 : vector<160x128xf32>
    %15 = vector.shape_cast %14 : vector<160x128xf32> to vector<10x16x128xf32>
    %16 = tpu.iota {dimensions = array<i32: 0>} : vector<10x1x1xi32>
    %c0_i32 = arith.constant 0 : i32
    %17 = arith.cmpi sgt, %arg1, %c0_i32 : i32
    %c0_i32_16 = arith.constant 0 : i32
    %18 = vector.broadcast %c0_i32_16 : i32 to vector<10x1x1xi32>
    %19 = arith.cmpi sgt, %16, %18 : vector<10x1x1xi32>
    %20 = vector.broadcast %17 : i1 to vector<10x1x1xi1>
    %21 = arith.ori %20, %19 : vector<10x1x1xi1>
    %c1_i32 = arith.constant 1 : i32
    %22 = arith.cmpi slt, %arg1, %c1_i32 : i32
    %c9_i32 = arith.constant 9 : i32
    %23 = vector.broadcast %c9_i32 : i32 to vector<10x1x1xi32>
    %24 = arith.cmpi slt, %16, %23 : vector<10x1x1xi32>
    %25 = vector.broadcast %22 : i1 to vector<10x1x1xi1>
    %26 = arith.ori %25, %24 : vector<10x1x1xi1>
    %27 = arith.andi %21, %26 : vector<10x1x1xi1>
    %cst_17 = arith.constant 0.000000e+00 : f32
    %28 = vector.shape_cast %27 : vector<10x1x1xi1> to vector<10x1x1xi1>
    %29 = vector.broadcast %28 : vector<10x1x1xi1> to vector<10x16x128xi1>
    %30 = vector.broadcast %cst_17 : f32 to vector<10x16x128xf32>
    %31 = arith.select %29, %15, %30 : vector<10x16x128xi1>, vector<10x16x128xf32>
    %32 = arith.truncf %31 : vector<10x16x128xf32> to vector<10x16x128xbf16>
    %cst_18 = arith.constant 0.000000e+00 : bf16
    %33 = vector.broadcast %cst_18 : bf16 to vector<10x1x128xbf16>
    %34 = tpu.concatenate %33, %32, %33 in 1 : vector<10x1x128xbf16>, vector<10x16x128xbf16>, vector<10x1x128xbf16> -> vector<10x18x128xbf16>
    %35 = vector.extract_strided_slice %34 {offsets = [0, 0, 0], sizes = [8, 16, 128], strides = [1, 1, 1]} : vector<10x18x128xbf16> to vector<8x16x128xbf16>
    %36 = vector.extract_strided_slice %34 {offsets = [0, 1, 0], sizes = [8, 16, 128], strides = [1, 1, 1]} : vector<10x18x128xbf16> to vector<8x16x128xbf16>
    %37 = vector.extract_strided_slice %34 {offsets = [0, 2, 0], sizes = [8, 16, 128], strides = [1, 1, 1]} : vector<10x18x128xbf16> to vector<8x16x128xbf16>
    %38 = tpu.concatenate %35, %36, %37 in 2 : vector<8x16x128xbf16>, vector<8x16x128xbf16>, vector<8x16x128xbf16> -> vector<8x16x384xbf16>
    %39 = vector.shape_cast %38 : vector<8x16x384xbf16> to vector<128x384xbf16>
    %c0_19 = arith.constant 0 : index
    %c0_20 = arith.constant 0 : index
    %c0_21 = arith.constant 0 : index
    %40 = vector.load %arg7[%c0_19, %c0_20, %c0_21] : memref<3x384x128xbf16, #tpu.memory_space<vmem>>, vector<1x384x128xbf16>
    %41 = vector.shape_cast %40 : vector<1x384x128xbf16> to vector<384x128xbf16>
    %cst_22 = arith.constant dense<0.000000e+00> : vector<128x128xf32>
    %42 = tpu.matmul %39, %41, %cst_22 {dimension_numbers = #tpu.dot_dimension_numbers<[1], [0], [0], [1], [0, 0, 1, 1], [], []>} : vector<128x384xbf16>, vector<384x128xbf16>, vector<128x128xf32> -> vector<128x128xf32>
    %43 = vector.extract_strided_slice %34 {offsets = [1, 0, 0], sizes = [8, 16, 128], strides = [1, 1, 1]} : vector<10x18x128xbf16> to vector<8x16x128xbf16>
    %44 = vector.extract_strided_slice %34 {offsets = [1, 1, 0], sizes = [8, 16, 128], strides = [1, 1, 1]} : vector<10x18x128xbf16> to vector<8x16x128xbf16>
    %45 = vector.extract_strided_slice %34 {offsets = [1, 2, 0], sizes = [8, 16, 128], strides = [1, 1, 1]} : vector<10x18x128xbf16> to vector<8x16x128xbf16>
    %46 = tpu.concatenate %43, %44, %45 in 2 : vector<8x16x128xbf16>, vector<8x16x128xbf16>, vector<8x16x128xbf16> -> vector<8x16x384xbf16>
    %47 = vector.shape_cast %46 : vector<8x16x384xbf16> to vector<128x384xbf16>
    %c1 = arith.constant 1 : index
    %c0_23 = arith.constant 0 : index
    %c0_24 = arith.constant 0 : index
    %48 = vector.load %arg7[%c1, %c0_23, %c0_24] : memref<3x384x128xbf16, #tpu.memory_space<vmem>>, vector<1x384x128xbf16>
    %49 = vector.shape_cast %48 : vector<1x384x128xbf16> to vector<384x128xbf16>
    %cst_25 = arith.constant dense<0.000000e+00> : vector<128x128xf32>
    %50 = tpu.matmul %47, %49, %cst_25 {dimension_numbers = #tpu.dot_dimension_numbers<[1], [0], [0], [1], [0, 0, 1, 1], [], []>} : vector<128x384xbf16>, vector<384x128xbf16>, vector<128x128xf32> -> vector<128x128xf32>
    %51 = arith.addf %42, %50 : vector<128x128xf32>
    %52 = vector.extract_strided_slice %34 {offsets = [2, 0, 0], sizes = [8, 16, 128], strides = [1, 1, 1]} : vector<10x18x128xbf16> to vector<8x16x128xbf16>
    %53 = vector.extract_strided_slice %34 {offsets = [2, 1, 0], sizes = [8, 16, 128], strides = [1, 1, 1]} : vector<10x18x128xbf16> to vector<8x16x128xbf16>
    %54 = vector.extract_strided_slice %34 {offsets = [2, 2, 0], sizes = [8, 16, 128], strides = [1, 1, 1]} : vector<10x18x128xbf16> to vector<8x16x128xbf16>
    %55 = tpu.concatenate %52, %53, %54 in 2 : vector<8x16x128xbf16>, vector<8x16x128xbf16>, vector<8x16x128xbf16> -> vector<8x16x384xbf16>
    %56 = vector.shape_cast %55 : vector<8x16x384xbf16> to vector<128x384xbf16>
    %c2 = arith.constant 2 : index
    %c0_26 = arith.constant 0 : index
    %c0_27 = arith.constant 0 : index
    %57 = vector.load %arg7[%c2, %c0_26, %c0_27] : memref<3x384x128xbf16, #tpu.memory_space<vmem>>, vector<1x384x128xbf16>
    %58 = vector.shape_cast %57 : vector<1x384x128xbf16> to vector<384x128xbf16>
    %cst_28 = arith.constant dense<0.000000e+00> : vector<128x128xf32>
    %59 = tpu.matmul %56, %58, %cst_28 {dimension_numbers = #tpu.dot_dimension_numbers<[1], [0], [0], [1], [0, 0, 1, 1], [], []>} : vector<128x384xbf16>, vector<384x128xbf16>, vector<128x128xf32> -> vector<128x128xf32>
    %60 = arith.addf %51, %59 : vector<128x128xf32>
    %c0_29 = arith.constant 0 : index
    %c0_30 = arith.constant 0 : index
    %61 = vector.load %arg8[%c0_29, %c0_30] : memref<1x128xf32, #tpu.memory_space<vmem>>, vector<1x128xf32>
    %62 = vector.broadcast %61 : vector<1x128xf32> to vector<128x128xf32>
    %63 = arith.addf %60, %62 : vector<128x128xf32>
    %cst_31 = arith.constant 0.000000e+00 : f32
    %64 = vector.broadcast %cst_31 : f32 to vector<128x128xf32>
    %65 = arith.maximumf %63, %64 : vector<128x128xf32>
    %66 = arith.truncf %65 : vector<128x128xf32> to vector<128x128xbf16>
    %c0_32 = arith.constant 0 : index
    %c0_33 = arith.constant 0 : index
    %67 = vector.load %arg9[%c0_32, %c0_33] : memref<128x128xbf16, #tpu.memory_space<vmem>>, vector<128x128xbf16>
    %cst_34 = arith.constant dense<0.000000e+00> : vector<128x128xf32>
    %68 = tpu.matmul %66, %67, %cst_34 {dimension_numbers = #tpu.dot_dimension_numbers<[1], [0], [0], [1], [0, 0, 1, 1], [], []>} : vector<128x128xbf16>, vector<128x128xbf16>, vector<128x128xf32> -> vector<128x128xf32>
    %c0_35 = arith.constant 0 : index
    %c0_36 = arith.constant 0 : index
    %69 = vector.load %arg10[%c0_35, %c0_36] : memref<1x128xf32, #tpu.memory_space<vmem>>, vector<1x128xf32>
    %70 = vector.broadcast %69 : vector<1x128xf32> to vector<128x128xf32>
    %71 = arith.addf %68, %70 : vector<128x128xf32>
    %c0_37 = arith.constant 0 : index
    %c0_38 = arith.constant 0 : index
    %c0_39 = arith.constant 0 : index
    %c0_40 = arith.constant 0 : index
    %72 = vector.load %arg2[%c0_37, %c0_38, %c0_39, %c0_40] : memref<1x8x16x128xbf16, #tpu.memory_space<vmem>>, vector<1x8x16x128xbf16>
    %73 = vector.shape_cast %72 : vector<1x8x16x128xbf16> to vector<8x16x128xbf16>
    %74 = arith.extf %73 : vector<8x16x128xbf16> to vector<8x16x128xf32>
    %75 = vector.shape_cast %74 : vector<8x16x128xf32> to vector<128x128xf32>
    %76 = arith.addf %71, %75 : vector<128x128xf32>
    %cst_41 = arith.constant 0.000000e+00 : f32
    %77 = vector.broadcast %cst_41 : f32 to vector<128x128xf32>
    %78 = arith.maximumf %76, %77 : vector<128x128xf32>
    %79 = vector.shape_cast %78 : vector<128x128xf32> to vector<1x8x16x128xf32>
    %80 = arith.truncf %79 : vector<1x8x16x128xf32> to vector<1x8x16x128xbf16>
    %c0_42 = arith.constant 0 : index
    %c0_43 = arith.constant 0 : index
    %c0_44 = arith.constant 0 : index
    %c0_45 = arith.constant 0 : index
    %81 = vector.load %arg11[%c0_42, %c0_43, %c0_44, %c0_45] : memref<1x8x16x128xbf16, #tpu.memory_space<vmem>>, vector<1x8x16x128xbf16>
    tpu.vector_store %arg11[%c0_42, %c0_43, %c0_44, %c0_45], %80 {strides = array<i32>} : memref<1x8x16x128xbf16, #tpu.memory_space<vmem>>, vector<1x8x16x128xbf16>,
    return
  }
  func.func @transform_0(%arg0: i32, %arg1: i32) -> (i32, i32, i32, i32) {
    %c0_i32 = arith.constant 0 : i32
    %c0_i32_0 = arith.constant 0 : i32
    %c0_i32_1 = arith.constant 0 : i32
    return %arg0, %arg1, %c0_i32, %c0_i32_0 : i32, i32, i32, i32
  }
  func.func @transform_1(%arg0: i32, %arg1: i32) -> (i32, i32, i32, i32) {
    %c8_i32 = arith.constant 8 : i32
    %0 = arith.muli %arg1, %c8_i32 : i32
    %c1_i32 = arith.constant 1 : i32
    %1 = arith.subi %0, %c1_i32 : i32
    %c0_i32 = arith.constant 0 : i32
    %2 = arith.maxsi %1, %c0_i32 : i32
    %c0_i32_0 = arith.constant 0 : i32
    %c0_i32_1 = arith.constant 0 : i32
    %c0_i32_2 = arith.constant 0 : i32
    return %arg0, %2, %c0_i32_0, %c0_i32_1 : i32, i32, i32, i32
  }
  func.func @transform_2(%arg0: i32, %arg1: i32) -> (i32, i32, i32, i32) {
    %c8_i32 = arith.constant 8 : i32
    %0 = arith.muli %arg1, %c8_i32 : i32
    %c8_i32_0 = arith.constant 8 : i32
    %1 = arith.addi %0, %c8_i32_0 : i32
    %c15_i32 = arith.constant 15 : i32
    %2 = arith.minsi %1, %c15_i32 : i32
    %c0_i32 = arith.constant 0 : i32
    %c0_i32_1 = arith.constant 0 : i32
    %c0_i32_2 = arith.constant 0 : i32
    return %arg0, %2, %c0_i32, %c0_i32_1 : i32, i32, i32, i32
  }
  func.func @transform_3(%arg0: i32, %arg1: i32) -> (i32, i32) {
    %c0_i32 = arith.constant 0 : i32
    %c0_i32_0 = arith.constant 0 : i32
    %c0_i32_1 = arith.constant 0 : i32
    return %c0_i32, %c0_i32_0 : i32, i32
  }
  func.func @transform_4(%arg0: i32, %arg1: i32) -> (i32, i32) {
    %c0_i32 = arith.constant 0 : i32
    %c0_i32_0 = arith.constant 0 : i32
    %c0_i32_1 = arith.constant 0 : i32
    return %c0_i32, %c0_i32_0 : i32, i32
  }
  func.func @transform_5(%arg0: i32, %arg1: i32) -> (i32, i32, i32) {
    %c0_i32 = arith.constant 0 : i32
    %c0_i32_0 = arith.constant 0 : i32
    %c0_i32_1 = arith.constant 0 : i32
    %c0_i32_2 = arith.constant 0 : i32
    return %c0_i32, %c0_i32_0, %c0_i32_1 : i32, i32, i32
  }
  func.func @transform_6(%arg0: i32, %arg1: i32) -> (i32, i32) {
    %c0_i32 = arith.constant 0 : i32
    %c0_i32_0 = arith.constant 0 : i32
    %c0_i32_1 = arith.constant 0 : i32
    return %c0_i32, %c0_i32_0 : i32, i32
  }
  func.func @transform_7(%arg0: i32, %arg1: i32) -> (i32, i32) {
    %c0_i32 = arith.constant 0 : i32
    %c0_i32_0 = arith.constant 0 : i32
    %c0_i32_1 = arith.constant 0 : i32
    return %c0_i32, %c0_i32_0 : i32, i32
  }
  func.func @transform_8(%arg0: i32, %arg1: i32) -> (i32, i32) {
    %c0_i32 = arith.constant 0 : i32
    %c0_i32_0 = arith.constant 0 : i32
    %c0_i32_1 = arith.constant 0 : i32
    return %c0_i32, %c0_i32_0 : i32, i32
  }
  func.func @transform_9(%arg0: i32, %arg1: i32) -> (i32, i32, i32, i32) {
    %c0_i32 = arith.constant 0 : i32
    %c0_i32_0 = arith.constant 0 : i32
    %c0_i32_1 = arith.constant 0 : i32
    return %arg0, %arg1, %c0_i32, %c0_i32_0 : i32, i32, i32, i32
  }
}

</mosaic_0001>

<bundles_post_ra>
// kernel: tpu_custom_call.1
= control target key start
LH: loop header
LB: loop body
LE: loop exit
PB: predicated region body
PF: predicated region fallthrough
CT: control target
= control target key end

     0   :  { %s5234_s0 = inlined_call_operand.hbm [shape: bf16[2,16,16,128], index: 0, kind: input, shape index: {}]   ;;  %s5235_s1 = inlined_call_operand.hbm [shape: bf16[2,16,16,128], index: 1, kind: input, shape index: {}]   ;;  %s5236_s2 = inlined_call_operand.hbm [shape: bf16[2,16,16,128], index: 2, kind: input, shape index: {}]   ;;  %s5237_s3 = inlined_call_operand.hbm [shape: bf16[128,128], index: 3, kind: input, shape index: {}]   ;;  %s5238_s4 = inlined_call_operand.vmem [shape: f32[1,128], index: 4, kind: input, shape index: {}]   ;;  %s5239_s5 = inlined_call_operand.hbm [shape: bf16[3,384,128], index: 5, kind: input, shape index: {}]   ;;  %s5240_s6 = inlined_call_operand.vmem [shape: f32[1,128], index: 6, kind: input, shape index: {}]   ;;  %s5241_s7 = inlined_call_operand.hbm [shape: bf16[128,128], index: 7, kind: input, shape index: {}]   ;;  %s5242_s8 = inlined_call_operand.vmem [shape: f32[1,128], index: 8, kind: input, shape index: {}]   ;;  %s5243_s9 = inlined_call_operand.hbm [shape: bf16[2,16,16,128], index: 9, kind: output, shape index: {}]  }
   0x1   :  { %5268 = sst [smem:[#allocation35_spill]] %s5234_s0 }
   0x2   :  { %5269 = sst [smem:[#allocation36_spill]] %s5235_s1 }
   0x3   :  { %5270 = sst [smem:[#allocation37_spill]] %s5236_s2 }
   0x4   :  { %5271 = sst [smem:[#allocation38_spill]] %s5237_s3 }
   0x5   :  { %5272 = sst [smem:[#allocation39_spill]] %s5238_s4 }
   0x6   :  { %5273 = sst [smem:[#allocation40_spill]] %s5239_s5 }
   0x7   :  { %5274 = sst [smem:[#allocation41_spill]] %s5240_s6 }
   0x8   :  { %5275 = sst [smem:[#allocation42_spill]] %s5241_s7 }
   0x9   :  { %5276 = sst [smem:[#allocation43_spill]] %s5242_s8 }
   0xa   :  { %5277 = sst [smem:[#allocation44_spill]] %s5243_s9 }
   0xb   :  { %14 = vsyncpa [#allocation3], 0 }
   0xc   :  { %16 = vsyncpa [#allocation3 + $0x1], 0 }
   0xd   :  { %17 = vsyncpa [#allocation6], 0 }
   0xe   :  { %19 = vsyncpa [#allocation6 + $0x1], 0 }
   0xf   :  { %20 = vsyncpa [#allocation9], 0 }
  0x10   :  { %21 = vsyncpa [#allocation12], 0 }
  0x11   :  { %22 = vsyncpa [#allocation4], 0 }
  0x12   :  { %24 = vsyncpa [#allocation4 + $0x1], 0  ;;  %s4219_s30 = smov 0   ;;  %s4221_s10 = smov 0  }
  0x13   :  { %s4223_s11 = smov 0   ;;  %s4225_s12 = smov 0  }
  0x14   :  { %s4227_s13 = smov 0   ;;  %s4229_s14 = smov 0  }
  0x15   :  { %s4231_s15 = smov 0   ;;  %s4233_s16 = smov 0  }
  0x16   :  { %s4235_s17 = smov 0   ;;  %s4237_s18 = smov 0  }
  0x17   :  { %s4239_s19 = smov 0   ;;  %s4241_s20 = smov 0  }
  0x18   :  { %s4243_s21 = smov 0   ;;  %s4245_s22 = smov 0  }
  0x19 LB: > { %5278 = sst [smem:[#allocation20_spill]] %s4104_s30  ;;  %s4290_s23 = sadd.s32 4294967295, %s4156_s22   ;;  %s4156_s22 = sphi %s4245_s22, %s30_s22   ;;  %s4152_s21 = sphi %s4243_s21, %s5356_s21   ;;  %s4148_s20 = sphi %s4241_s20, %s5364_s20   ;;  %s4144_s19 = sphi %s4239_s19, %s5354_s19   ;;  %s4140_s18 = sphi %s4237_s18, %s5353_s18   ;;  %s4136_s17 = sphi %s4235_s17, %s5363_s17   ;;  %s4132_s16 = sphi %s4233_s16, %s5362_s16   ;;  %s4128_s15 = sphi %s4231_s15, %s5361_s15   ;;  %s4124_s14 = sphi %s4229_s14, %s5360_s14   ;;  %s4120_s13 = sphi %s4227_s13, %s5359_s13   ;;  %s4116_s12 = sphi %s4225_s12, %s5350_s12   ;;  %s4112_s11 = sphi %s4223_s11, %s5358_s11   ;;  %s4108_s10 = sphi %s4221_s10, %s5349_s10   ;;  %s4104_s30 = sphi %s4219_s30, %s5357_s30  }
  0x1a   : > { %5279 = sst [smem:[#allocation21_spill]] %s4108_s10  ;;  %p2877_p0 = scmp.ge.s32.totalorder %s4156_s22, 1 }
  0x1b   : > { %5280 = sst [smem:[#allocation22_spill]] %s4112_s11  ;;  %p5263_p1 = scmp.eq.s32.totalorder %s4290_s23, 0 }
  0x1c   : > { %5281 = sst [smem:[#allocation23_spill]] %s4120_s13  ;;  %p301_p3 = scmp.lt.s32.totalorder %s4156_s22, 5 }
  0x1d   : > { %5282 = sst [smem:[#allocation24_spill]] %s4140_s18  ;;  %s4158_s25 = smov [#allocation8]  }
  0x1e   : > { %5283 = sst [smem:[#allocation25_spill]] %s4144_s19  ;;  %p4296_p4 = pnand %p2877_p0, %p301_p3 }
  0x1f   : > { %5284 = sst [smem:[#allocation26_spill]] %s4148_s20  ;;  %s313_s26 = sshll.u32 %s4158_s25, 4  ;;  %s314_s26 = int_to_ptr.vmem [resolvable:$true] %s313_s26 }
  0x20   : > { %5285 = sst [smem:[#allocation27_spill]] %s4152_s21  ;;  %p3569_p5 = pneg %p4296_p4 }
  0x21   : > { %s5286_s24 = scalar_select %p4296_p4, 1, 0 }
  0x22   : > { %p4304_p6 = pnand %p3569_p5, %p5263_p1  ;;  %s3845_s28 = scalar_lea.vmem %s314_s26, 1024 }
  0x23   : > { %5287 = sst [smem:[#allocation28_spill]] %s5286_s24  ;;  %p3846_p8 = scmp.ne.s32.totalorder %s314_s26, %s3845_s28 }
  0x24   : > { %p3836_p7 = pneg %p4304_p6  ;;  %p3853_p11 = scmp.lt.s32.totalorder %s314_s26, %s314_s26 }
  0x25   : > { %p3854_p12 = scmp.lt.s32.totalorder %s3845_s28, %s3845_s28 }
  0x26   : > { %p3848_p9 = pnand %p3846_p8, %p3836_p7 }
  0x27   : > { %p3855_p13 = por %p3854_p12, %p3853_p11 }
  0x28   : > { %p3849_p10 = pneg %p3848_p9 }
  0x2a   : > { %p3856_p0 = pnand %p3855_p13, %p3849_p10 }
  0x2c   : > { %3859 = shalt.err (!%p3856_p0)
}
  0x2d   : > { %s5247_s29 = smov 64   ;;  %s5249_s25 = smov 4  }
  0x2e   : > { %s5289_s3 = sld [smem:[#allocation38_spill]]  ;;  %s39_s19 = sadd.s32 1, %s4148_s20 }
  0x2f   : > { %s42_s8 = sadd.s32 1, %s4152_s21  ;;  %p40_p3 = scmp.ge.s32.totalorder %s39_s19, 2 }
  0x30   : > { %p5264_p5 = scmp.eq.s32.totalorder %s4156_s22, 0  ;;  %s2871_s6 = sshll.u32 %s4148_s20, 3 }
  0x31   : > { %s87_s4 = sadd.s32 1, %s4124_s14  ;;  %s5366_s19 = smov (%p40_p3, %s39_s19), 0 }
  0x32   : > { %5290 = sst [smem:[#allocation29_spill]] %s5366_s19  ;;  %s5368_s8 = smov (!%p40_p3, %s42_s8), %s4152_s21 }
  0x33   : > { %s47_s18 = ssub.s32 %s4148_s20, %s5366_s19  ;;  %s2872_s24 = sadd.s32 4294967295, %s2871_s6 }
  0x34   : > { %3572 = dma.hbm_to_vmem [thread:$0]  (!%p4304_p6), %s5289_s3, 1024, %s314_s26, [#allocation9], %s5247_s29, %s5247_s29, %s5249_s25  }
  0x35   : > { %p44_p8 = scmp.ge.s32.totalorder %s5368_s8, 2  ;;  %p76_p9 = scmp.gt.s32.totalorder %s2872_s24, 0 }
  0x36   : > { %s2873_s9 = sshll.u32 %s5366_s19, 3  ;;  %p94_p10 = scmp.ne.s32.totalorder %s4124_s14, %s4120_s13 }
  0x37   : > { %s5370_s8 = smov (%p44_p8, %s5368_s8), 0  ;;  %s5372_s24 = smov (!%p76_p9, %s2872_s24), 0 }
  0x38   : > { %5291 = sst [smem:[#allocation30_spill]] %s5370_s8  ;;  %s4338_s26 = ssub.s32 %s4152_s21, %s5370_s8 }
  0x39   : > { %5292 = sst [smem:[#allocation31_spill]] %s4338_s26  ;;  %s2874_s28 = sadd.s32 4294967295, %s2873_s9 }
  0x3a   : > { %s4341_s29 = sor.u32 %s47_s18, %s4338_s26  ;;  %p80_p11 = scmp.gt.s32.totalorder %s2874_s28, 0 }
  0x3b   : > { %p49_p12 = scmp.eq.s32.totalorder %s4341_s29, 0  ;;  %p4346_p13 = por %p94_p10, %p5264_p5 }
  0x3c   : > { %s5374_s28 = smov (!%p80_p11, %s2874_s28), 0  ;;  %p100_p0 = scmp.ne.s32.totalorder %s4120_s13, %s4116_s12 }
  0x3d   : > { %s4352_s3 = sadd.s32 8, %s2871_s6  ;;  %s83_s8 = ssub.s32 %s5372_s24, %s5374_s28 }
  0x3e   : > { %5294 = sst [smem:[#allocation32_spill]] %s4352_s3  ;;  %s84_s18 = sor.u32 %s83_s8, %s4338_s26 }
  0x3f   : > { %p4358_p8 = por %p100_p0, %p5263_p1  ;;  %p85_p9 = scmp.eq.s32.totalorder %s84_s18, 0 }
  0x40   : > { %s4362_s2 = sadd.s32 8, %s2873_s9  ;;  %p5262_p11 = scmp.lt.s32.totalorder %s4156_s22, 4 }
  0x41   : > { %s5295_s19 = scalar_select %p4358_p8, 1, 0 }
  0x42   : > { %s4367_s12 = scalar_select %p85_p9, %s4124_s14, %s87_s4  }
  0x43   : > { %5296 = sst [smem:[#allocation33_spill]] %s5295_s19  ;;  %s4370_s6 = sshll.u32 %s4152_s21, 5 }
  0x44   : > { %5297 = sst [smem:[#allocation34_spill]] %s4367_s12  ;;  %s386_s28 = sand.u32 1, %s4156_s22  }
  0x45   : > { %s388_s8 = sand.u32 1, %s4124_s14   ;;  %s2890_s26 = sshll.u32 %s5372_s24, 1 }
  0x46   : > { %s2887_s13 = sshll.u32 %s388_s8, 3  ;;  %s400_s30 = sadd.s32 %s2890_s26, %s4370_s6 }
  0x47   : > { %s2892_s10 = sshll.u32 %s400_s30, 6  ;;  %s390_s19 = scalar_lea.vmem [#allocation5], %s2887_s13 }
  0x48   : > { %s403_s18 = sshll.u32 %s390_s19, 4  ;;  %s5298_s1 = sld [smem:[#allocation36_spill]]  ;;  %s404_s18 = int_to_ptr.vmem [resolvable:$true] %s403_s18 }
  0x49   : > { %p4382_p0 = pnand %p5262_p11, %p4346_p13  ;;  %s4161_s21 = smov [#allocation10]  }
  0x4a   : > { %s329_s12 = sshll.u32 %s4161_s21, 4  ;;  %s4388_s24 = scalar_lea.sflag [#allocation6], %s386_s28  ;;  %s4386_s12 = int_to_ptr.vmem [resolvable:$true] %s329_s12 }
  0x4b   : > { %p3862_p9 = pneg %p4382_p0  ;;  %s3873_s30 = scalar_lea.vmem %s404_s18, 128 }
  0x4c   : > { %p3874_p10 = scmp.ne.s32.totalorder %s404_s18, %s3873_s30  ;;  %s4162_s3 = smov [#allocation5]  }
  0x4e   : > { %s402_s9 = scalar_lea.hbm %s5298_s1, %s2892_s10  ;;  %p3876_p3 = pnand %p3874_p10, %p3862_p9 }
  0x4f   : > { %s3878_s10 = sshll.u32 %s4162_s3, 4  ;;  %s3879_s10 = int_to_ptr.vmem [resolvable:$false] %s3878_s10 }
  0x50   : > { %p3877_p2 = pneg %p3876_p3  ;;  %s3880_s11 = scalar_lea.vmem %s3879_s10, 256 }
  0x51   : > { %p3881_p13 = scmp.lt.s32.totalorder %s404_s18, %s3879_s10  ;;  %p3882_p11 = scmp.lt.s32.totalorder %s3880_s11, %s3873_s30 }
  0x53   : > { %p3883_p1 = por %p3882_p11, %p3881_p13 }
  0x55   : > { %p3884_p5 = pnand %p3883_p1, %p3877_p2 }
  0x57   : > { %3887 = shalt.err (!%p3884_p5)
}
  0x58   : > { %s5300_s13 = smov 4   ;;  %s5301_s19 = smov 64  }
  0x59   : > { %3585 = dma.hbm_to_vmem [thread:$0]  (!%p4382_p0), %s402_s9, 128, %s404_s18, %s4388_s24, %s5301_s19, %s5301_s19, %s5300_s13  }
  0x5a   : > { %s3899_s21 = scalar_lea.vmem %s4386_s12, 9216  ;;  %p3907_p1 = scmp.lt.s32.totalorder %s4386_s12, %s4386_s12 }
  0x5b   : > { %p3900_p3 = scmp.ne.s32.totalorder %s4386_s12, %s3899_s21  ;;  %p3908_p2 = scmp.lt.s32.totalorder %s3899_s21, %s3899_s21 }
  0x5d   : > { %p3902_p10 = pnand %p3900_p3, %p3836_p7  ;;  %p3909_p5 = por %p3908_p2, %p3907_p1 }
  0x5f   : > { %p3903_p9 = pneg %p3902_p10 }
  0x61   : > { %p3910_p11 = pnand %p3909_p5, %p3903_p9 }
  0x63   : > { %3913 = shalt.err (!%p3910_p11)
}
  0x64   : > { %s5302_s5 = sld [smem:[#allocation40_spill]]  ;;  %s4163_s28 = smov [#allocation11]  }
  0x65   : > { %s345_s8 = sshll.u32 %s4163_s28, 4  ;;  %s346_s8 = int_to_ptr.vmem [resolvable:$true] %s345_s8 }
  0x66   : > { %s3925_s18 = scalar_lea.vmem %s346_s8, 1024  ;;  %p3933_p10 = scmp.lt.s32.totalorder %s346_s8, %s346_s8 }
  0x67   : > { %p3926_p0 = scmp.ne.s32.totalorder %s346_s8, %s3925_s18  ;;  %p3934_p9 = scmp.lt.s32.totalorder %s3925_s18, %s3925_s18 }
  0x69   : > { %p3928_p13 = pnand %p3926_p0, %p3836_p7  ;;  %p3935_p1 = por %p3934_p9, %p3933_p10 }
  0x6a   : > { %3575 = dma.hbm_to_vmem [thread:$0]  (!%p4304_p6), %s5302_s5, 9216, %s4386_s12, [#allocation9], %s5301_s19, %s5301_s19, %s5300_s13  }
  0x6b   : > { %p3929_p3 = pneg %p3928_p13 }
  0x6d   : > { %p3936_p2 = pnand %p3935_p1, %p3929_p3 }
  0x6f   : > { %3939 = shalt.err (!%p3936_p2)
}
  0x70   : > { %s5303_s7 = sld [smem:[#allocation42_spill]]  ;;  %s2870_s27 = sadd.s32 4294967294, %s4156_s22  }
  0x71   : > { %s51_s4 = sadd.s32 1, %s4136_s17  ;;  %p58_p7 = scmp.ne.s32.totalorder %s4136_s17, %s4132_s16 }
  0x72   : > { %s4430_s30 = scalar_select %p49_p12, %s4136_s17, %s51_s4  }
  0x73   : > { %p64_p5 = scmp.ne.s32.totalorder %s4132_s16, %s4128_s15  ;;  %p294_p11 = scmp.eq.s32.totalorder %s2870_s27, 3 }
  0x74   : > { %s362_s3 = sand.u32 1, %s4136_s17   ;;  %p5304_p0 = scmp.eq.s32.totalorder %s4156_s22, 0 }
  0x75   : > { %p5305_p3 = scmp.eq.s32.totalorder %s4290_s23, 0  ;;  %p5307_p9 = scmp.eq.s32.totalorder %s4290_s23, 3 }
  0x76   : > { %3578 = dma.hbm_to_vmem [thread:$0]  (!%p4304_p6), %s5303_s7, 1024, %s346_s8, [#allocation12], %s5301_s19, %s5301_s19, %s5300_s13  }
  0x77   : > { %p60_p13 = por %p5304_p0, %p58_p7  ;;  %p4441_p10 = por %p5305_p3, %p64_p5 }
  0x78   : > { %p4447_p1 = por %p5307_p9, %p58_p7  ;;  %p4451_p6 = por %p294_p11, %p64_p5 }
  0x79   : > { %s2882_s21 = sshll.u32 %s362_s3, 6  ;;  %s3030_s25 = sshll.u32 %s4148_s20, 4 }
  0x7a   : > { %s5308_s11 = scalar_select %p4447_p1, 1, 0 }
  0x7b   : > { %s5309_s29 = scalar_select %p4451_p6, 1, 0 }
  0x7c   : > { %s373_s26 = sadd.s32 %s3030_s25, %s4370_s6  ;;  %s366_s28 = scalar_lea.vmem [#allocation2], %s2882_s21 }
  0x7d   : > { %s376_s8 = sshll.u32 %s366_s28, 4  ;;  %s2886_s18 = sshll.u32 %s373_s26, 6  ;;  %s377_s8 = int_to_ptr.vmem [resolvable:$true] %s376_s8 }
  0x7e   : > { %s5310_s0 = sld [smem:[#allocation35_spill]]  ;;  %p5311_p12 = scmp.lt.s32.totalorder %s4156_s22, 4 }
  0x7f   : > { %s363_s1 = scalar_lea.sflag [#allocation3], %s362_s3  ;;  %s3953_s5 = scalar_lea.vmem %s377_s8, 1024 }
  0x80   : > { %p4462_p2 = pnand %p5311_p12, %p60_p13  ;;  %p3954_p5 = scmp.ne.s32.totalorder %s377_s8, %s3953_s5 }
  0x81   : > { %s4164_s21 = smov [#allocation2]  }
  0x82   : > { %p3942_p7 = pneg %p4462_p2  ;;  %s3958_s25 = sshll.u32 %s4164_s21, 4  ;;  %s3959_s25 = int_to_ptr.vmem [resolvable:$false] %s3958_s25 }
  0x83   : > { %s3960_s26 = scalar_lea.vmem %s3959_s25, 2048  ;;  %p3961_p3 = scmp.lt.s32.totalorder %s377_s8, %s3959_s25 }
  0x84   : > { %s375_s27 = scalar_lea.hbm %s5310_s0, %s2886_s18  ;;  %p3956_p11 = pnand %p3954_p5, %p3942_p7 }
  0x85   : > { %p3962_p9 = scmp.lt.s32.totalorder %s3960_s26, %s3953_s5 }
  0x86   : > { %p3957_p0 = pneg %p3956_p11 }
  0x87   : > { %p3963_p6 = por %p3962_p9, %p3961_p3 }
  0x89   : > { %p3964_p1 = pnand %p3963_p6, %p3957_p0 }
  0x8b   : > { %3967 = shalt.err (!%p3964_p1)
}
  0x8c   : > { %s5313_s3 = sld [smem:[#allocation22_spill]]  ;;  %p5319_p1 = scmp.lt.s32.totalorder %s4362_s2, 15 }
  0x8d   : > { %s5314_s28 = sld [smem:[#allocation32_spill]]  ;;  %p5320_p7 = scmp.eq.s32.totalorder %s4156_s22, 0 }
  0x8e   : > { %s5315_s18 = sld [smem:[#allocation21_spill]]  ;;  %s5378_s2 = smov (!%p5319_p1, %s4362_s2), 15 }
  0x8f   : > { %s5316_s12 = sld [smem:[#allocation20_spill]]  ;;  %p5321_p0 = scmp.eq.s32.totalorder %s4290_s23, 0 }
  0x90   : > { %s5317_s9 = sld [smem:[#allocation31_spill]] }
  0x91   : > { %3582 = dma.hbm_to_vmem [thread:$0]  (!%p4462_p2), %s375_s27, 1024, %s377_s8, %s363_s1, %s5301_s19, %s5301_s19, %s5300_s13  }
  0x92   : > { %s123_s5 = sadd.s32 1, %s5313_s3  ;;  %s415_s21 = sand.u32 1, %s5313_s3  }
  0x93   : > { %p5318_p13 = scmp.lt.s32.totalorder %s5314_s28, 15  ;;  %s2893_s1 = sshll.u32 %s415_s21, 3 }
  0x94   : > { %p130_p6 = scmp.ne.s32.totalorder %s5313_s3, %s5315_s18  ;;  %s417_s7 = scalar_lea.vmem [#allocation7], %s2893_s1 }
  0x95   : > { %s5376_s28 = smov (!%p5318_p13, %s5314_s28), 15  ;;  %p136_p12 = scmp.ne.s32.totalorder %s5315_s18, %s5316_s12 }
  0x96   : > { %s119_s4 = ssub.s32 %s5376_s28, %s5378_s2  ;;  %p132_p5 = por %p130_p6, %p5320_p7 }
  0x97   : > { %s120_s25 = sor.u32 %s119_s4, %s5317_s9  ;;  %p4490_p3 = por %p136_p12, %p5321_p0 }
  0x98   : > { %p121_p11 = scmp.eq.s32.totalorder %s120_s25, 0  ;;  %s2895_s8 = sshll.u32 %s5376_s28, 1 }
  0x99   : > { %s5322_s26 = scalar_select %p4490_p3, 1, 0 }
  0x9a   : > { %s5380_s3 = smov (!%p121_p11, %s5313_s3), %s123_s5  ;;  %s427_s27 = sadd.s32 %s2895_s8, %s4370_s6 }
  0x9b   : > { %s2897_s0 = sshll.u32 %s427_s27, 6  ;;  %s430_s18 = sshll.u32 %s417_s7, 4  ;;  %s431_s18 = int_to_ptr.vmem [resolvable:$true] %s430_s18 }
  0x9c   : > { %s5323_s20 = sld [smem:[#allocation37_spill]]  ;;  %p5324_p2 = scmp.lt.s32.totalorder %s4156_s22, 4 }
  0x9d   : > { %s3981_s28 = scalar_lea.vmem %s431_s18, 128  ;;  %s4165_s6 = smov [#allocation7]  }
  0x9e   : > { %p4503_p9 = pnand %p5324_p2, %p132_p5  ;;  %p3982_p1 = scmp.ne.s32.totalorder %s431_s18, %s3981_s28 }
  0x9f   : > { %s3986_s5 = sshll.u32 %s4165_s6, 4  ;;  %s3987_s5 = int_to_ptr.vmem [resolvable:$false] %s3986_s5 }
  0xa0   : > { %p3970_p13 = pneg %p4503_p9  ;;  %s3988_s7 = scalar_lea.vmem %s3987_s5, 256 }
  0xa1   : > { %p3989_p7 = scmp.lt.s32.totalorder %s431_s18, %s3987_s5  ;;  %p3990_p11 = scmp.lt.s32.totalorder %s3988_s7, %s3981_s28 }
  0xa2   : > { %s429_s9 = scalar_lea.hbm %s5323_s20, %s2897_s0  ;;  %p3984_p6 = pnand %p3982_p1, %p3970_p13 }
  0xa3   : > { %p3991_p0 = por %p3990_p11, %p3989_p7 }
  0xa4   : > { %p3985_p12 = pneg %p3984_p6 }
  0xa6   : > { %p3992_p3 = pnand %p3991_p0, %p3985_p12 }
  0xa8   : > { %3995 = shalt.err (!%p3992_p3)
}
  0xa9   : > { %3588 = dma.hbm_to_vmem [thread:$0]  (!%p4503_p9), %s429_s9, 128, %s431_s18, %s4388_s24, %s5301_s19, %s5301_s19, %s5300_s13  }
  0xaa   : > { %442 = sbr.rel (%p4296_p4) target bundleno = 1043 (0x413), region = 56  ;;  %s4518_s20 = sand.u32 (!%p4296_p4), 1, %s4132_s16  }
  0xab   : > { %s2899_s21 = sshll.u32 (!%p4296_p4), %s4518_s20, 6  ;;  %s445_s25 = scalar_lea.sflag (!%p4296_p4), [#allocation3], %s4518_s20 }
  0xac   : > { %s4524_s1 = scalar_lea.vmem (!%p4296_p4), [#allocation2], %s2899_s21 }
  0xaf   : > { %4079 = dma.done.wait (%p4441_p10), %s445_s25, 1024  }
  0xb0   : > { %4081 = vsyncadd (%p4441_p10), %s445_s25, 4294966272  ;;  %s5327_s24 = sld [smem:[#allocation23_spill]]  ;;  %s453_s19 = sand.u32 1, %s4290_s23  }
  0xb1   : > { %s454_s18 = scalar_lea.sflag [#allocation6], %s453_s19 }
  0xb6   : > { %s455_s8 = sand.u32 1, %s5327_s24  }
  0xb7   : > { %s2900_s27 = sshll.u32 %s455_s8, 3 }
  0xb8   : > { %s457_s12 = scalar_lea.vmem [#allocation5], %s2900_s27 }
  0xb9   : > { %4083 = dma.done.wait (%p4358_p8), %s454_s18, 128  }
  0xba   : > { %4085 = vsyncadd (%p4358_p8), %s454_s18, 4294967168  ;;  %s5329_s2 = sld [smem:[#allocation21_spill]]  ;;  %p5330_p4 = scmp.ne.s32.totalorder %s5322_s26, 0 }
  0xc0   : > { %s464_s9 = sand.u32 1, %s5329_s2  }
  0xc1   : > { %s4537_s4 = sshll.u32 %s464_s9, 3 }
  0xc2   : > { %s466_s10 = scalar_lea.vmem [#allocation7], %s4537_s4 }
  0xc3   : > { %4087 = dma.done.wait (%p5330_p4), %s454_s18, 128  }
  0xc4   : > { %4089 = vsyncadd (%p5330_p4), %s454_s18, 4294967168  ;;  %p5331_p10 = scmp.eq.s32.totalorder %s4290_s23, 0 }
  0xc6   : > { %4091 = dma.done.wait (%p5331_p10), [#allocation9], 10240   ;;  %p5332_p5 = pmov %p5331_p10 }
  0xc8   : > { %4093 = vsyncadd (%p5332_p5), [#allocation9], 4294957056  ;;  %p5333_p8 = pmov %p5332_p5 }
  0xc9   : > { %p5334_p3 = pmov %p5332_p5 }
  0xca   : > { %4095 = dma.done.wait (%p5333_p8), [#allocation12], 1024  }
  0xcb   : > { %4097 = vsyncadd (%p5334_p3), [#allocation12], 4294966272  ;;  %v3720_v0 = vld [vmem:[#allocation8 + $0x38] sm:$0xff]   ;;  %v3721_v1 = vld [vmem:[#allocation8 + $0x30] sm:$0xff]   ;;  %s5335_s23 = sld [smem:[#allocation24_spill]]  ;;  %vm950_vm1 = vcmask 1040384  }
  0xcc   : > { %3369 = vmatprep.subr.bf16.mxu0 %v3720_v0  ;;  %v3722_v2 = vld [vmem:[#allocation8 + $0x28] sm:$0xff]   ;;  %v3723_v3 = vld [vmem:[#allocation8 + $0x20] sm:$0xff]   ;;  %v3724_v5 = vld [vmem:[#allocation8 + $0x18] sm:$0xff]   ;;  %s5336_s6 = sld [smem:[#allocation39_spill]]  ;;  %vm951_vm2 = vsmask.f32 256 }
  0xcd   : > { %3370 = vmatpush3.bf16.msra.mxu0 %v3720_v0  ;;  %v3728_v4 = vld [vmem:[%s457_s12] sm:$0xff]   ;;  %v3738_v6 = vld [vmem:[#allocation10 + $0x138] sm:$0xff]   ;;  %v3725_v7 = vld [vmem:[#allocation8 + $0x10] sm:$0xff]   ;;  %vm1094_vm4 = vcmask 1046528   ;;  %vm973_vm5 = vsmask.f32 7424 }
  0xce   : > { %3371 = vmatprep.subr.bf16.mxu0 %v3721_v1  ;;  %3385 = vmatprep.mubr.bf16.mxu0 %v3728_v4  ;;  %v3739_v8 = vld [vmem:[#allocation10 + $0xf8] sm:$0xff]   ;;  %v3740_v9 = vld [vmem:[#allocation10 + $0x130] sm:$0xff]   ;;  %v3726_v11 = vld [vmem:[#allocation8 + $0x8] sm:$0xff]   ;;  %s5341_s24 = sld [smem:[#allocation41_spill]]  ;;  %s5125_s27 = scalar_lea.vmem [#allocation13], %s2899_s21 }
  0xcf   : > { %3113 = vmatprep.subr.bf16.mxu1 %v3738_v6  ;;  %v3741_v10 = vld [vmem:[#allocation10 + $0xf0] sm:$0xff]   ;;  %v3727_v12 = vld [vmem:[#allocation8] sm:$0xff]   ;;  %v538_v14 = vld [vmem:[%s4524_s1 + $0x8] sm:$0xff]   ;;  %s5342_s8 = sld [smem:[#allocation43_spill]]  ;;  %s2701_s2 = sshll.u32 %s5125_s27, 4  ;;  %s5150_s2 = int_to_ptr.vmem [resolvable:$true] %s2701_s2 }
  0xd0   : > { %3114 = vmatpush3.bf16.msra.mxu1 %v3739_v8  ;;  %v536_v13 = vld [vmem:[%s4524_s1] sm:$0xff]   ;;  %v3742_v15 = vld [vmem:[#allocation10 + $0x178] sm:$0xff]   ;;  %v540_v16 = vld [vmem:[%s4524_s1 + $0x10] sm:$0xff]   ;;  %s5343_s21 = sld [smem:[#allocation25_spill]]  ;;  %s2685_s28 = scalar_lea.sflag [#allocation4], %s4518_s20 }
  0xd1   : > { %3372 = vmatpush3.bf16.msra.mxu0 %v3721_v1  ;;  %3115 = vmatprep.subr.bf16.mxu1 %v3740_v9  ;;  %v542_v17 = vld [vmem:[%s4524_s1 + $0x18] sm:$0xff]   ;;  %v544_v18 = vld [vmem:[%s4524_s1 + $0x20] sm:$0xff]   ;;  %v546_v19 = vld [vmem:[%s4524_s1 + $0x28] sm:$0xff]   ;;  %p818_p2 = scmp.gt.s32.totalorder %s5335_s23, 0  ;;  %p822_p9 = scmp.lt.s32.totalorder %s5335_s23, 1 }
  0xd2   : > { %3373 = vmatprep.subr.bf16.mxu0 %v3722_v2  ;;  %v548_v20 = vld [vmem:[%s4524_s1 + $0x30] sm:$0xff]   ;;  %v550_v21 = vld [vmem:[%s4524_s1 + $0x38] sm:$0xff]   ;;  %v3743_v23 = vld [vmem:[#allocation10 + $0x128] sm:$0xff]   ;;  %s3047_s18 = sshll.u32 %s5335_s23, 4  ;;  %s5344_s23 = sld [smem:[#allocation44_spill]] }
  0xd3   : > { %v3737_v22 = vld [vmem:[%s466_s10] sm:$0xff]   ;;  %v3744_v24 = vld [vmem:[#allocation10 + $0xe8] sm:$0xff]   ;;  %v3746_v26 = vld [vmem:[#allocation10 + $0x120] sm:$0xff]   ;;  %s819_s5 = scalar_select %p818_p2, 1, 0 }
  0xd4   : > { %3116 = vmatpush3.bf16.msra.mxu1 %v3741_v10  ;;  %v3745_v25 = vld [vmem:[#allocation10 + $0x170] sm:$0xff]   ;;  %v3747_v27 = vld [vmem:[#allocation10 + $0xe0] sm:$0xff]   ;;  %v3748_v28 = vld [vmem:[#allocation10 + $0x168] sm:$0xff]   ;;  %s4584_s7 = scalar_select %p822_p9, 1, 0 }
  0xd5   : > { %3374 = vmatpush3.bf16.msra.mxu0 %v3722_v2  ;;  %3117 = vmatprep.subr.bf16.mxu1 %v3743_v23  ;;  %v3749_v29 = vld [vmem:[#allocation10 + $0x118] sm:$0xff]   ;;  %v3751_v31 = vld [vmem:[#allocation10 + $0x160] sm:$0xff]   ;;  %v3752_v32 = vld [vmem:[#allocation10 + $0x110] sm:$0xff]   ;;  %v820_v50 = vstv %s819_s5  ;;  %p5345_p1 = scmp.ne.s32.totalorder %s5308_s11, 0  ;;  %s4166_s5 = smov [#allocation13]  }
  0xd6   : > { %3375 = vmatprep.subr.bf16.mxu0 %v3723_v3  ;;  %v3750_v30 = vld [vmem:[#allocation10 + $0xd8] sm:$0xff]   ;;  %v3753_v33 = vld [vmem:[#allocation10 + $0xd0] sm:$0xff]   ;;  %v3755_v35 = vld [vmem:[#allocation10 + $0x108] sm:$0xff]   ;;  %vm821_vm0 = vcmp.eq.s32.totalorder %v820_v50, 1  ;;  %s3026_s12 = sshll.u32 %s5343_s21, 5 }
  0xd7   : > { %v3754_v34 = vld [vmem:[#allocation10 + $0x158] sm:$0xff]   ;;  %v3756_v36 = vld [vmem:[#allocation10 + $0xc8] sm:$0xff]   ;;  %v3757_v37 = vld [vmem:[#allocation10 + $0x150] sm:$0xff]  }
  0xd8   : > { %3118 = vmatpush3.bf16.msra.mxu1 %v3744_v24  ;;  %v3758_v38 = vld [vmem:[#allocation10 + $0x100] sm:$0xff]   ;;  %v3760_v40 = vld [vmem:[#allocation10 + $0x148] sm:$0xff]   ;;  %v4562_v42 = vld [vmem:[#allocation10 + $0xb8] sm:$0xff]  }
  0xd9   : > { %3376 = vmatpush3.bf16.msra.mxu0 %v3723_v3  ;;  %3119 = vmatprep.subr.bf16.mxu1 %v3746_v26  ;;  %v3759_v39 = vld [vmem:[#allocation10 + $0xc0] sm:$0xff]   ;;  %v3762_v43 = vld [vmem:[#allocation10 + $0x78] sm:$0xff]   ;;  %vm4577_vm3 = vmand %vm950_vm1, %vm951_vm2 }
  0xda   : > { %3377 = vmatprep.subr.bf16.mxu0 %v3724_v5  ;;  %v3761_v41 = vld [vmem:[#allocation10 + $0x140] sm:$0xff]  }
  0xdb   : > { %v4569_v45 = vld [vmem:[%s5336_s6] ss:$0 sm:$0xff]  ;;  %s3996_s6 = scalar_lea.vmem %s5150_s2, 1024 }
  0xdc   : > { %3120 = vmatpush3.bf16.msra.mxu1 %v3747_v27  ;;  %p3997_p13 = scmp.ne.s32.totalorder %s5150_s2, %s3996_s6 }
  0xdd   : > { %3378 = vmatpush3.bf16.msra.mxu0 %v3724_v5  ;;  %3121 = vmatprep.subr.bf16.mxu1 %v3749_v29 }
  0xde   : > { %3379 = vmatprep.subr.bf16.mxu0 %v3725_v7  ;;  %p3998_p6 = pnand %p3997_p13, %p5345_p1 }
  0xe0   : > { %3122 = vmatpush3.bf16.msra.mxu1 %v3750_v30  ;;  %p3999_p12 = pneg %p3998_p6 }
  0xe1   : > { %3380 = vmatpush3.bf16.msra.mxu0 %v3725_v7  ;;  %3123 = vmatprep.subr.bf16.mxu1 %v3752_v32 }
  0xe2   : > { %3381 = vmatprep.subr.bf16.mxu0 %v3726_v11 }
  0xe4   : > { %3124 = vmatpush3.bf16.msra.mxu1 %v3753_v33 }
  0xe5   : > { %3382 = vmatpush3.bf16.msra.mxu0 %v3726_v11  ;;  %3125 = vmatprep.subr.bf16.mxu1 %v3755_v35 }
  0xe6   : > { %3383 = vmatprep.subr.bf16.mxu0 %v3727_v12 }
  0xe8   : > { %3126 = vmatpush3.bf16.msra.mxu1 %v3756_v36 }
  0xe9   : > { %3384 = vmatpush3.bf16.msra.mxu0 %v3727_v12  ;;  %3127 = vmatprep.subr.bf16.mxu1 %v3758_v38 }
  0xea   : > { %3405 = vmatprep.subr.bf16.mxu0 %v3742_v15 }
  0xec   : > { %3386 = vmatmul.mubr.bf16.vlgmr.msra.gmra.mxu0 %v536_v13  ;;  %3128 = vmatpush3.bf16.msra.mxu1 %v3759_v39 }
  0xed   : > { %3389 = vmatprep.mubr.bf16.mxu0 %v538_v14  ;;  %3406 = vmatpush3.bf16.msra.mxu0 %v3742_v15 }
  0xee   : > { %3407 = vmatprep.subr.bf16.mxu0 %v3745_v25  ;;  %3193 = vmatprep.subr.bf16.mxu1 %v3762_v43 }
  0xf1   : > { %3408 = vmatpush3.bf16.msra.mxu0 %v3745_v25 }
  0xf2   : > { %3409 = vmatprep.subr.bf16.mxu0 %v3748_v28 }
  0xf4   : > { %3390 = vmatmul.mubr.bf16.gmra.mxu0 %v540_v16 }
  0xf5   : > { %3393 = vmatprep.mubr.bf16.mxu0 %v542_v17  ;;  %3410 = vmatpush3.bf16.msra.mxu0 %v3748_v28  ;;  %v824_v17 = vstv %s4584_s7  ;;  %s4000_s7 = sshll.u32 %s4166_s5, 4  ;;  %s4001_s7 = int_to_ptr.vmem [resolvable:$false] %s4000_s7 }
  0xf6   : > { %3411 = vmatprep.subr.bf16.mxu0 %v3751_v31  ;;  %vm4627_vm6 = vcmp.eq.s32.totalorder %v824_v17, 1  ;;  %s4002_s0 = scalar_lea.vmem %s4001_s7, 2048  ;;  %p4003_p7 = scmp.lt.s32.totalorder %s5150_s2, %s4001_s7 }
  0xf7   : > { %p4004_p11 = scmp.lt.s32.totalorder %s4002_s0, %s3996_s6 }
  0xf9   : > { %3412 = vmatpush3.bf16.msra.mxu0 %v3751_v31  ;;  %p4005_p0 = por %p4004_p11, %p4003_p7 }
  0xfa   : > { %3413 = vmatprep.subr.bf16.mxu0 %v3754_v34 }
  0xfb   : > { %p4006_p4 = pnand %p4005_p0, %p3999_p12 }
  0xfc   : > { %3394 = vmatmul.mubr.bf16.gmra.mxu0 %v544_v18 }
  0xfd   : > { %3397 = vmatprep.mubr.bf16.mxu0 %v546_v19  ;;  %3414 = vmatpush3.bf16.msra.mxu0 %v3754_v34 }
  0xfe   : > { %3415 = vmatprep.subr.bf16.mxu0 %v3757_v37 }
 0x101   : > { %3416 = vmatpush3.bf16.msra.mxu0 %v3757_v37 }
 0x102   : > { %3417 = vmatprep.subr.bf16.mxu0 %v3760_v40 }
 0x104   : > { %3398 = vmatmul.mubr.bf16.gmra.mxu0 %v548_v20 }
 0x105   : > { %3401 = vmatprep.mubr.bf16.mxu0 %v550_v21  ;;  %3418 = vmatpush3.bf16.msra.mxu0 %v3760_v40 }
 0x106   : > { %3419 = vmatprep.subr.bf16.mxu0 %v3761_v41 }
 0x109   : > { %3420 = vmatpush3.bf16.msra.mxu0 %v3761_v41 }
 0x10a   : > { %3437 = vmatprep.subr.bf16.mxu0 %v4562_v42 }
 0x10c   : > { %3402 = vmatmul.mubr.bf16.gmra.mxu0 %v3737_v22 }
 0x1ac   : > { %v3387_v44 = vpop.f32.mrf.mxu0 }
 0x1ad   : > { %v728_v47 = vadd.f32 %v3387_v44, %v4569_v45 }
 0x1ae   : > { %v719_v46 = vpop.f32.mrf.mxu0 }
 0x1af   : > { %v720_v48 = vadd.f32 %v4569_v45, %v719_v46  ;;  %v800_v53 = vmax.f32 %v728_v47, 0.0 }
 0x1b0   : > { %v3388_v49 = vpop.f32.mrf.mxu0 }
 0x1b1   : > { %v731_v51 = vadd.f32 %v3388_v49, %v4569_v45  ;;  %v798_v54 = vmax.f32 %v720_v48, 0.0 }
 0x1b2   : > { %v722_v52 = vpop.f32.mrf.mxu0 }
 0x1b3   : > { %v801_v55 = vmax.f32 %v731_v51, 0.0  ;;  %v723_v56 = vadd.f32 %v4569_v45, %v722_v52  ;;  %v830_v62 = vsel %vm821_vm0, %v798_v54, 0.0  ;;  %v3763_v51 = vld [vmem:[#allocation10 + $0x38] sm:$0xff]  }
 0x1b4   : > { %v3391_v57 = vpop.f32.mrf.mxu0 }
 0x1b5   : > { %v851_v58 = vpack.c.bf16 %v801_v55, %v800_v53  ;;  %v799_v59 = vmax.f32 %v723_v56, 0.0  ;;  %v744_v60 = vadd.f32 %v3391_v57, %v4569_v45  ;;  %v3765_v57 = vld [vmem:[#allocation10 + $0x70] sm:$0xff]  }
 0x1b6   : > { %v735_v61 = vpop.f32.mrf.mxu0 }
 0x1b7   : > { %v868_v63 = vshrl.u32 %v851_v58, 16  ;;  %v831_v0 = vsel %vm821_vm0, %v799_v59, 0.0  ;;  %v736_v3 = vadd.f32 %v4569_v45, %v735_v61  ;;  %v871_v6 = vshll.u32 %v851_v58, 16 }
 0x1b8   : > { %v850_v2 = vpack.c.bf16 %v831_v0, %v830_v62  ;;  %v3392_v4 = vpop.f32.mrf.mxu0  ;;  %v804_v9 = vmax.f32 %v744_v60, 0.0 }
 0x1b9   : > { %v870_v5 = vrot.slane %v868_v63, 7  ;;  %v747_v7 = vadd.f32 %v3392_v4, %v4569_v45  ;;  %v802_v15 = vmax.f32 %v736_v3, 0.0 }
 0x1ba   : > { %v861_v8 = vshrl.u32 %v850_v2, 16  ;;  %v738_v10 = vpop.f32.mrf.mxu0  ;;  %v864_v40 = vshll.u32 %v850_v2, 16 }
 0x1bb   : > { %v873_v11 = vor.u32 %v871_v6, %v870_v5  ;;  %v805_v12 = vmax.f32 %v747_v7, 0.0  ;;  %v739_v13 = vadd.f32 %v4569_v45, %v738_v10  ;;  %v964_v14 = vsel %vm4577_vm3, %v870_v5, 0 }
 0x1bc   : > { %v3395_v16 = vpop.f32.mrf.mxu0  ;;  %v1099_v24 = vrot.slane %v964_v14, 1  ;;  %v994_v26 = vshll.u32 %v964_v14, 16  ;;  %v4598_v27 = vrot.slane %v861_v8, 7 }
 0x1bd   : > { %v4593_v18 = vsel %vm4577_vm3, 0, %v873_v11  ;;  %v853_v19 = vpack.c.bf16 %v805_v12, %v804_v9  ;;  %v803_v20 = vmax.f32 %v739_v13, 0.0  ;;  %v760_v21 = vadd.f32 %v3395_v16, %v4569_v45  ;;  %v3767_v9 = vld [vmem:[#allocation10 + $0x30] sm:$0xff]  }
 0x1be   : > { %v751_v22 = vpop.f32.mrf.mxu0  ;;  %v1098_v23 = vrot.slane %v4593_v18, 1  ;;  %v989_v25 = vshll.u32 %v4593_v18, 16  ;;  %v987_v30 = vshrl.u32 %v4593_v18, 16  ;;  %v996_v46 = vrot.slane %v994_v26, 1 }
 0x1bf   : > { %v882_v28 = vshrl.u32 %v853_v19, 16  ;;  %v852_v29 = vpack.c.bf16 %v803_v20, %v802_v15  ;;  %v885_v31 = vshll.u32 %v853_v19, 16  ;;  %v752_v32 = vadd.f32 %v4569_v45, %v751_v22  ;;  %v3766_v20 = vld [vmem:[#allocation10 + $0xb0] sm:$0xff]  }
 0x1c0   : > { %v3396_v33 = vpop.f32.mrf.mxu0  ;;  %v4603_v34 = vsel %vm1094_vm4, %v1098_v23, %v1099_v24  ;;  %v991_v35 = vrot.slane %v989_v25, 1  ;;  %v808_v38 = vmax.f32 %v760_v21, 0.0  ;;  %v4609_v52 = vor.u32 %v864_v40, %v4598_v27  ;;  %v3769_v21 = vld [vmem:[#allocation10 + $0x68] sm:$0xff]  }
 0x1c1   : > { %v884_v36 = vrot.slane %v882_v28, 7  ;;  %v875_v37 = vshrl.u32 %v852_v29, 16  ;;  %v763_v39 = vadd.f32 %v3396_v33, %v4569_v45  ;;  %3421 = vmatprep.mubr.bf16.mxu0 %v4603_v34  ;;  %v878_v41 = vshll.u32 %v852_v29, 16 }
 0x1c2   : > { %v754_v43 = vpop.f32.mrf.mxu0  ;;  %v992_v44 = vor.u32 %v991_v35, %v987_v30  ;;  %v806_v53 = vmax.f32 %v752_v32, 0.0  ;;  %v3771_v32 = vld [vmem:[#allocation10 + $0x28] sm:$0xff]  }
 0x1c3   : > { %v887_v47 = vor.u32 %v885_v31, %v884_v36  ;;  %v877_v48 = vrot.slane %v875_v37, 7  ;;  %v809_v49 = vmax.f32 %v763_v39, 0.0  ;;  %v755_v50 = vadd.f32 %v4569_v45, %v754_v43  ;;  %v3773_v39 = vld [vmem:[#allocation10 + $0x60] sm:$0xff]  }
 0x1c4   : > { %v3399_v54 = vpop.f32.mrf.mxu0  ;;  %v4612_v55 = vsel %vm973_vm5, %v992_v44, %v996_v46  ;;  %v4616_v56 = vsel %vm4577_vm3, %v884_v36, 0  ;;  %v3768_v46 = vld [vmem:[#allocation10 + $0xa8] sm:$0xff]  }
 0x1c5   : > { %v4620_v58 = vsel %vm4577_vm3, 0, %v887_v47  ;;  %v880_v59 = vor.u32 %v878_v41, %v877_v48  ;;  %v965_v60 = vsel %vm4577_vm3, %v877_v48, 0  ;;  %v855_v61 = vpack.c.bf16 %v809_v49, %v808_v38  ;;  %1419 = vmatprep.mubr.bf16.mxu1 %v4612_v55 }
 0x1c6   : > { %v1102_v62 = vrot.slane %v965_v60, 1  ;;  %v807_v63 = vmax.f32 %v755_v50, 0.0  ;;  %v776_v0 = vadd.f32 %v3399_v54, %v4569_v45  ;;  %v767_v2 = vpop.f32.mrf.mxu0  ;;  %1420 = vmatmul.mubr.bf16.vlgmr.msra.gmra.mxu1 %v4593_v18  ;;  %v1104_v4 = vrot.slane %v4620_v58, 1 }
 0x1c7   : > { %v4634_v5 = vsel %vm4577_vm3, 0, %v880_v59  ;;  %v896_v6 = vshrl.u32 %v855_v61, 16  ;;  %v899_v7 = vshll.u32 %v855_v61, 16  ;;  %v768_v8 = vadd.f32 %v4569_v45, %v767_v2  ;;  %3194 = vmatpush3.bf16.msra.mxu1 %v3763_v51  ;;  %v3775_v59 = vld [vmem:[#allocation10 + $0x20] sm:$0xff]  }
 0x1c8   : > { %v854_v10 = vpack.c.bf16 %v807_v63, %v806_v53  ;;  %v812_v11 = vmax.f32 %v776_v0, 0.0  ;;  %v3400_v12 = vpop.f32.mrf.mxu0  ;;  %v1101_v13 = vrot.slane %v4634_v5, 1  ;;  %v1105_v14 = vrot.slane %v4616_v56, 1  ;;  %3195 = vmatprep.subr.bf16.mxu1 %v3765_v57 }
 0x1c9   : > { %v4639_v15 = vrot.slane %v896_v6, 7  ;;  %v810_v16 = vmax.f32 %v768_v8, 0.0  ;;  %v779_v17 = vadd.f32 %v3400_v12, %v4569_v45  ;;  %v999_v19 = vshrl.u32 %v4634_v5, 16  ;;  %v3770_v8 = vld [vmem:[#allocation10 + $0xa0] sm:$0xff]  }
 0x1ca   : > { %v889_v22 = vshrl.u32 %v854_v10, 16  ;;  %v892_v23 = vshll.u32 %v854_v10, 16  ;;  %v770_v24 = vpop.f32.mrf.mxu0  ;;  %v4644_v25 = vsel %vm1094_vm4, %v1101_v13, %v1102_v62  ;;  %v4647_v26 = vsel %vm1094_vm4, %v1104_v4, %v1105_v14 }
 0x1cb   : > { %v901_v28 = vor.u32 %v899_v7, %v4639_v15  ;;  %v813_v29 = vmax.f32 %v779_v17, 0.0  ;;  %v771_v30 = vadd.f32 %v4569_v45, %v770_v24  ;;  %3422 = vmatmul.mubr.bf16.vlgmr.msra.gmra.mxu0 %v4644_v25  ;;  %v1001_v31 = vshll.u32 %v4634_v5, 16  ;;  %3196 = vmatpush3.bf16.msra.mxu1 %v3767_v9  ;;  %v3777_v9 = vld [vmem:[#allocation10 + $0x58] sm:$0xff]  }
 0x1cc   : > { %v891_v33 = vrot.slane %v889_v22, 7  ;;  %v3403_v35 = vpop.f32.mrf.mxu0  ;;  %3425 = vmatprep.mubr.bf16.mxu0 %v4647_v26  ;;  %3438 = vmatpush3.bf16.msra.mxu0 %v4562_v42  ;;  %v1006_v36 = vshll.u32 %v965_v60, 16  ;;  %v1011_v37 = vshrl.u32 %v4620_v58, 16  ;;  %v1013_v38 = vshll.u32 %v4620_v58, 16 }
 0x1cd   : > { %v4659_v40 = vsel %vm4577_vm3, 0, %v901_v28  ;;  %v857_v41 = vpack.c.bf16 %v813_v29, %v812_v11  ;;  %v811_v43 = vmax.f32 %v771_v30, 0.0  ;;  %v792_v44 = vadd.f32 %v3403_v35, %v4569_v45  ;;  %3439 = vmatprep.subr.bf16.mxu0 %v3766_v20  ;;  %3197 = vmatprep.subr.bf16.mxu1 %v3769_v21 }
 0x1ce   : > { %v894_v47 = vor.u32 %v892_v23, %v891_v33  ;;  %v783_v48 = vpop.f32.mrf.mxu0  ;;  %v1003_v42 = vrot.slane %v1001_v31, 1  ;;  %v1008_v49 = vrot.slane %v1006_v36, 1  ;;  %v1015_v50 = vrot.slane %v1013_v38, 1  ;;  %v3772_v31 = vld [vmem:[#allocation10 + $0x98] sm:$0xff]  }
 0x1cf   : > { %v910_v51 = vshrl.u32 %v857_v41, 16  ;;  %v913_v53 = vshll.u32 %v857_v41, 16  ;;  %v856_v54 = vpack.c.bf16 %v811_v43, %v810_v16  ;;  %v816_v57 = vmax.f32 %v792_v44, 0.0  ;;  %3198 = vmatpush3.bf16.msra.mxu1 %v3771_v32  ;;  %v3782_v32 = vld [vmem:[#allocation10 + $0x50] sm:$0xff]  }
 0x1d0   : > { %v4664_v60 = vsel %vm4577_vm3, 0, %v894_v47  ;;  %v784_v61 = vadd.f32 %v4569_v45, %v783_v48  ;;  %v1004_v62 = vor.u32 %v1003_v42, %v999_v19  ;;  %v3404_v63 = vpop.f32.mrf.mxu0  ;;  %3440 = vmatpush3.bf16.msra.mxu0 %v3766_v20  ;;  %v1016_v0 = vor.u32 %v1015_v50, %v1011_v37  ;;  %3199 = vmatprep.subr.bf16.mxu1 %v3773_v39  ;;  %v3774_v50 = vld [vmem:[#allocation10 + $0x90] sm:$0xff]  }
 0x1d1   : > { %v4667_v2 = vrot.slane %v910_v51, 7  ;;  %v903_v4 = vshrl.u32 %v856_v54, 16  ;;  %v906_v6 = vshll.u32 %v856_v54, 16  ;;  %v848_v7 = vsel %vm4627_vm6, %v816_v57, 0.0  ;;  %3441 = vmatprep.subr.bf16.mxu0 %v3768_v46  ;;  %v3784_v51 = vld [vmem:[#allocation10 + $0x10] sm:$0xff]  }
 0x1d2   : > { %v814_v10 = vmax.f32 %v784_v61, 0.0  ;;  %v4672_v11 = vsel %vm973_vm5, %v1004_v62, %v1008_v49  ;;  %v795_v12 = vadd.f32 %v3404_v63, %v4569_v45  ;;  %v1018_v13 = vshll.u32 %v4616_v56, 16  ;;  %v786_v14 = vpop.f32.mrf.mxu0  ;;  %v3779_v56 = vld [vmem:[#allocation10 + $0x18] sm:$0xff]   ;;  %v3788_v61 = vld [vmem:[#allocation10 + $0x48] sm:$0xff]  }
 0x1d3   : > { %v915_v16 = vor.u32 %v913_v53, %v4667_v2  ;;  %v905_v17 = vrot.slane %v903_v4, 7  ;;  %1427 = vmatprep.mubr.bf16.mxu1 %v4672_v11  ;;  %v787_v19 = vadd.f32 %v4569_v45, %v786_v14  ;;  %v967_v20 = vsel %vm4577_vm3, %v891_v33, 0  ;;  %3200 = vmatpush3.bf16.msra.mxu1 %v3775_v59 }
 0x1d4   : > { %v817_v21 = vmax.f32 %v795_v12, 0.0  ;;  %1428 = vmatmul.mubr.bf16.gmra.mxu1 %v4634_v5  ;;  %v1020_v22 = vrot.slane %v1018_v13, 1  ;;  %v1107_v23 = vrot.slane %v4664_v60, 1  ;;  %v1108_v24 = vrot.slane %v967_v20, 1  ;;  %3442 = vmatpush3.bf16.msra.mxu0 %v3768_v46 }
 0x1d5   : > { %v4685_v28 = vsel %vm4577_vm3, 0, %v915_v16  ;;  %v908_v29 = vor.u32 %v906_v6, %v905_v17  ;;  %v815_v30 = vmax.f32 %v787_v19, 0.0  ;;  %v968_v45 = vsel %vm4577_vm3, %v4639_v15, 0  ;;  %3443 = vmatprep.subr.bf16.mxu0 %v3770_v8  ;;  %3201 = vmatprep.subr.bf16.mxu1 %v3777_v9  ;;  %v3776_v16 = vld [vmem:[#allocation10 + $0x88] sm:$0xff]  }
 0x1d6   : > { %v849_v33 = vsel %vm4627_vm6, %v817_v21, 0.0  ;;  %v4693_v35 = vsel %vm973_vm5, %v1016_v0, %v1020_v22  ;;  %v4696_v36 = vsel %vm1094_vm4, %v1107_v23, %v1108_v24  ;;  %v1110_v37 = vrot.slane %v4659_v40, 1  ;;  %v3790_v21 = vld [vmem:[#allocation10 + $0x8] sm:$0xff]  }
 0x1d7   : > { %v4701_v38 = vsel %vm4577_vm3, 0, %v908_v29  ;;  %v859_v15 = vpack.c.bf16 %v849_v33, %v848_v7  ;;  %1435 = vmatprep.mubr.bf16.mxu1 %v4693_v35  ;;  %v858_v39 = vpack.c.bf16 %v815_v30, %v814_v10  ;;  %3426 = vmatmul.mubr.bf16.gmra.mxu0 %v4696_v36  ;;  %v1111_v3 = vrot.slane %v968_v45, 1 }
 0x1d8   : > { %3444 = vmatpush3.bf16.msra.mxu0 %v3770_v8  ;;  %v1023_v41 = vshrl.u32 %v4664_v60, 16  ;;  %v1025_v43 = vshll.u32 %v4664_v60, 16  ;;  %v1030_v44 = vshll.u32 %v967_v20, 16  ;;  %v4709_v46 = vsel %vm4577_vm3, %v905_v17, 0  ;;  %3202 = vmatpush3.bf16.msra.mxu1 %v3779_v56  ;;  %v3794_v56 = vld [vmem:[#allocation10 + $0x40] sm:$0xff]  }
 0x1d9   : > { %v924_v47 = vshrl.u32 %v859_v15, 16  ;;  %v927_v48 = vshll.u32 %v859_v15, 16  ;;  %v917_v42 = vshrl.u32 %v858_v39, 16  ;;  %v920_v49 = vshll.u32 %v858_v39, 16  ;;  %3445 = vmatprep.subr.bf16.mxu0 %v3772_v31  ;;  %3203 = vmatprep.subr.bf16.mxu1 %v3782_v32  ;;  %v3778_v32 = vld [vmem:[#allocation10 + $0x80] sm:$0xff]  }
 0x1da   : > { %v4712_v53 = vsel %vm1094_vm4, %v1110_v37, %v1111_v3  ;;  %v1027_v54 = vrot.slane %v1025_v43, 1  ;;  %v1032_v57 = vrot.slane %v1030_v44, 1  ;;  %v1113_v59 = vrot.slane %v4701_v38, 1  ;;  %v3796_v15 = vld [vmem:[#allocation10] sm:$0xff]   ;;  %v4767_v44 = vld [vmem:[#allocation10 + $0x238] sm:$0xff]  }
 0x1db   : > { %v926_v62 = vrot.slane %v924_v47, 7  ;;  %v919_v63 = vrot.slane %v917_v42, 7  ;;  %3429 = vmatprep.mubr.bf16.mxu0 %v4712_v53  ;;  %v1114_v0 = vrot.slane %v4709_v46, 1  ;;  %v1035_v4 = vshrl.u32 %v4659_v40, 16  ;;  %v3780_v42 = vld [vmem:[#allocation10 + $0x1f8] sm:$0xff]  }
 0x1dc   : > { %1436 = vmatmul.mubr.bf16.gmra.mxu1 %v4620_v58  ;;  %v1028_v6 = vor.u32 %v1027_v54, %v1023_v41  ;;  %3446 = vmatpush3.bf16.msra.mxu0 %v3772_v31  ;;  %v1037_v7 = vshll.u32 %v4659_v40, 16  ;;  %v1042_v8 = vshll.u32 %v968_v45, 16  ;;  %v4723_v9 = vsel %vm4577_vm3, %v4667_v2, 0 }
 0x1dd   : > { %v929_v10 = vor.u32 %v927_v48, %v926_v62  ;;  %v922_v12 = vor.u32 %v920_v49, %v919_v63  ;;  %v4726_v13 = vsel %vm1094_vm4, %v1113_v59, %v1114_v0  ;;  %3447 = vmatprep.subr.bf16.mxu0 %v3774_v50  ;;  %v1116_v14 = vrot.slane %v4685_v28, 1  ;;  %3204 = vmatpush3.bf16.msra.mxu1 %v3784_v51 }
 0x1de   : > { %v4732_v17 = vsel %vm4577_vm3, 0, %v4609_v52  ;;  %v4735_v19 = vsel %vm973_vm5, %v1028_v6, %v1032_v57  ;;  %v1039_v2 = vrot.slane %v1037_v7, 1  ;;  %v1117_v20 = vrot.slane %v4723_v9, 1  ;;  %3205 = vmatprep.subr.bf16.mxu1 %v3788_v61 }
 0x1df   : > { %v4740_v22 = vsel %vm4577_vm3, 0, %v929_v10  ;;  %v4744_v23 = vsel %vm4577_vm3, 0, %v922_v12  ;;  %1443 = vmatprep.mubr.bf16.mxu1 %v4735_v19  ;;  %3430 = vmatmul.mubr.bf16.gmra.mxu0 %v4726_v13  ;;  %v1044_v52 = vrot.slane %v1042_v8, 1  ;;  %v4750_v24 = vsel %vm4577_vm3, %v919_v63, 0  ;;  %v3781_v8 = vld [vmem:[#allocation10 + $0x1b8] sm:$0xff]  }
 0x1e0   : > { %3448 = vmatpush3.bf16.msra.mxu0 %v3774_v50  ;;  %v1040_v29 = vor.u32 %v1039_v2, %v1035_v4  ;;  %v4753_v30 = vsel %vm1094_vm4, %v1116_v14, %v1117_v20  ;;  %v1190_v45 = vrot.slane %v4744_v23, 1  ;;  %v1191_v31 = vrot.slane %v4750_v24, 1  ;;  %v3785_v20 = vld [vmem:[#allocation10 + $0x1b0] sm:$0xff]  }
 0x1e1   : > { %3433 = vmatprep.mubr.bf16.mxu0 %v4753_v30  ;;  %3449 = vmatprep.subr.bf16.mxu0 %v3776_v16  ;;  %v1049_v33 = vshll.u32 %v4701_v38, 16  ;;  %v4762_v37 = vsel %vm4577_vm3, %v4598_v27, 0  ;;  %v1095_v39 = vrot.slane %v4732_v17, 1  ;;  %v1047_v3 = vshrl.u32 %v4701_v38, 16 }
 0x1e2   : > { %3206 = vmatpush3.bf16.msra.mxu1 %v3790_v21  ;;  %v1054_v43 = vshll.u32 %v4709_v46, 16  ;;  %v4771_v47 = vsel %vm973_vm5, %v1040_v29, %v1044_v52  ;;  %v4774_v27 = vsel %vm1094_vm4, %v1190_v45, %v1191_v31  ;;  %v1096_v48 = vrot.slane %v4762_v37, 1  ;;  %v3786_v29 = vld [vmem:[#allocation10 + $0x1e8] sm:$0xff]  }
 0x1e3   : > { %v1051_v41 = vrot.slane %v1049_v33, 1  ;;  %3207 = vmatprep.subr.bf16.mxu1 %v3794_v56  ;;  %v972_v46 = vsel %vm4577_vm3, %v926_v62, 0  ;;  %v1061_v54 = vshll.u32 %v4685_v28, 16  ;;  %v1920_v57 = vshrl.u32 %v4740_v22, 16  ;;  %v3787_v45 = vld [vmem:[#allocation10 + $0x1a8] sm:$0xff]   ;;  %v3789_v33 = vld [vmem:[#allocation10 + $0x1e0] sm:$0xff]  }
 0x1e4   : > { %1444 = vmatmul.mubr.bf16.gmra.mxu1 %v4664_v60  ;;  %3450 = vmatpush3.bf16.msra.mxu0 %v3776_v16  ;;  %v1097_v49 = vsel %vm1094_vm4, %v1095_v39, %v1096_v48  ;;  %v1056_v51 = vrot.slane %v1054_v43, 1  ;;  %v1922_v59 = vshll.u32 %v4740_v22, 16  ;;  %v1927_v61 = vshll.u32 %v972_v46, 16  ;;  %v3783_v16 = vld [vmem:[#allocation10 + $0x1f0] sm:$0xff]   ;;  %v3792_v43 = vld [vmem:[#allocation10 + $0x1d8] sm:$0xff]  }
 0x1e5   : > { %1451 = vmatprep.mubr.bf16.mxu1 %v4771_v47  ;;  %3451 = vmatprep.subr.bf16.mxu0 %v3778_v32  ;;  %v1052_v50 = vor.u32 %v1051_v41, %v1047_v3  ;;  %v1934_v1 = vrot.slane %v4740_v22, 1  ;;  %v1935_v62 = vrot.slane %v972_v46, 1  ;;  %v1059_v4 = vshrl.u32 %v4685_v28, 16  ;;  %v3793_v48 = vld [vmem:[#allocation10 + $0x198] sm:$0xff]   ;;  %v3795_v46 = vld [vmem:[#allocation10 + $0x1d0] sm:$0xff]  }
 0x1e6   : > { %3208 = vmatpush3.bf16.msra.mxu1 %v3796_v15  ;;  %v1924_v63 = vrot.slane %v1922_v59, 1  ;;  %v1929_v0 = vrot.slane %v1927_v61, 1  ;;  %v1063_v10 = vrot.slane %v1061_v54, 1  ;;  %v1066_v12 = vshll.u32 %v4723_v9, 16  ;;  %v3791_v15 = vld [vmem:[#allocation10 + $0x1a0] sm:$0xff]  }
 0x1e7   : > { %3434 = vmatmul.mubr.bf16.gmra.mxu0 %v4774_v27  ;;  %3469 = vmatprep.subr.bf16.mxu1 %v4767_v44  ;;  %v4789_v6 = vsel %vm1094_vm4, %v1934_v1, %v1935_v62  ;;  %v4793_v7 = vsel %vm973_vm5, %v1052_v50, %v1056_v51  ;;  %v1178_v56 = vshll.u32 %v4744_v23, 16  ;;  %v1176_v31 = vshrl.u32 %v4744_v23, 16  ;;  %v3797_v51 = vld [vmem:[#allocation10 + $0x190] sm:$0xff]   ;;  %v3799_v1 = vld [vmem:[#allocation10 + $0x188] sm:$0xff]   ;;  %v3800_v62 = vld [vmem:[#allocation10 + $0x1c0] sm:$0xff]  }
 0x1e8   : > { %3453 = vmatprep.mubr.bf16.mxu0 %v1097_v49  ;;  %3452 = vmatpush3.bf16.msra.mxu0 %v3778_v32  ;;  %v1925_v14 = vor.u32 %v1924_v63, %v1920_v57  ;;  %v1064_v21 = vor.u32 %v1063_v10, %v1059_v4  ;;  %v1068_v52 = vrot.slane %v1066_v12, 1  ;;  %v1183_v32 = vshll.u32 %v4750_v24, 16  ;;  %v3798_v57 = vld [vmem:[#allocation10 + $0x1c8] sm:$0xff]   ;;  %v3803_v63 = vld [vmem:[#allocation10 + $0x230] sm:$0xff]   ;;  %v3805_v4 = vld [vmem:[#allocation10 + $0x220] sm:$0xff]  }
 0x1e9   : > { %3273 = vmatprep.subr.bf16.mxu0 %v3780_v42  ;;  %v977_v41 = vshll.u32 %v4732_v17, 16  ;;  %v975_v49 = vshrl.u32 %v4732_v17, 16  ;;  %v982_v50 = vshll.u32 %v4762_v37, 16  ;;  %v3802_v37 = vld [vmem:[#allocation10 + $0x180] sm:$0xff]  }
 0x1ea   : > { %v4798_v2 = vsel %vm973_vm5, %v1925_v14, %v1929_v0  ;;  %v4805_v9 = vsel %vm973_vm5, %v1064_v21, %v1068_v52  ;;  %v1185_v3 = vrot.slane %v1183_v32, 1  ;;  %v3804_v0 = vld [vmem:[#allocation10 + $0x228] sm:$0xff]   ;;  %v3815_v14 = vld [vmem:[#allocation11 + $0x10] sm:$0xff]  }
 0x1eb   : > { %v979_v42 = vrot.slane %v977_v41, 1  ;;  %v984_v59 = vrot.slane %v982_v50, 1 }
 0x1ec   : > { %1452 = vmatmul.mubr.bf16.gmra.mxu1 %v4659_v40 }
 0x1ed   : > { %1459 = vmatprep.mubr.bf16.mxu1 %v4793_v7  ;;  %v980_v54 = vor.u32 %v979_v42, %v975_v49 }
 0x1ef   : > { %3454 = vmatmul.mubr.bf16.vlgmr.msra.gmra.mxu0 %v4603_v34  ;;  %v1180_v34 = vrot.slane %v1178_v56, 1  ;;  %v985_v61 = vsel %vm973_vm5, %v980_v54, %v984_v59 }
 0x1f0   : > { %3457 = vmatprep.mubr.bf16.mxu0 %v4644_v25  ;;  %3274 = vmatpush3.bf16.msra.mxu0 %v3781_v8 }
 0x1f1   : > { %3275 = vmatprep.subr.bf16.mxu0 %v3783_v16  ;;  %v1181_v39 = vor.u32 %v1180_v34, %v1176_v31 }
 0x1f3   : > { %v4815_v24 = vsel %vm973_vm5, %v1181_v39, %v1185_v3  ;;  %v3817_v39 = vld [vmem:[#allocation11] sm:$0xff]  }
 0x1f4   : > { %1460 = vmatmul.mubr.bf16.gmra.mxu1 %v4701_v38  ;;  %3276 = vmatpush3.bf16.msra.mxu0 %v3785_v20 }
 0x1f5   : > { %1467 = vmatprep.mubr.bf16.mxu1 %v4805_v9  ;;  %3277 = vmatprep.subr.bf16.mxu0 %v3786_v29  ;;  %v3816_v29 = vld [vmem:[#allocation11 + $0x8] sm:$0xff]  }
 0x1f7   : > { %3458 = vmatmul.mubr.bf16.gmra.mxu0 %v4647_v26 }
 0x1f8   : > { %3461 = vmatprep.mubr.bf16.mxu0 %v4696_v36  ;;  %3278 = vmatpush3.bf16.msra.mxu0 %v3787_v45 }
 0x1f9   : > { %3279 = vmatprep.subr.bf16.mxu0 %v3789_v33 }
 0x1fc   : > { %1468 = vmatmul.mubr.bf16.gmra.mxu1 %v4685_v28  ;;  %3280 = vmatpush3.bf16.msra.mxu0 %v3791_v15 }
 0x1fd   : > { %1475 = vmatprep.mubr.bf16.mxu1 %v4815_v24  ;;  %3281 = vmatprep.subr.bf16.mxu0 %v3792_v43 }
 0x1ff   : > { %3462 = vmatmul.mubr.bf16.gmra.mxu0 %v4712_v53 }
 0x200   : > { %3465 = vmatprep.mubr.bf16.mxu0 %v4726_v13  ;;  %3282 = vmatpush3.bf16.msra.mxu0 %v3793_v48 }
 0x201   : > { %3283 = vmatprep.subr.bf16.mxu0 %v3795_v46 }
 0x204   : > { %1476 = vmatmul.mubr.bf16.gmra.mxu1 %v4744_v23  ;;  %3284 = vmatpush3.bf16.msra.mxu0 %v3797_v51 }
 0x205   : > { %1757 = vmatprep.mubr.bf16.mxu1 %v985_v61  ;;  %3285 = vmatprep.subr.bf16.mxu0 %v3798_v57 }
 0x207   : > { %3466 = vmatmul.mubr.bf16.gmra.mxu0 %v4753_v30 }
 0x208   : > { %3286 = vmatpush3.bf16.msra.mxu0 %v3799_v1  ;;  %2163 = vmatprep.mubr.bf16.mxu0 %v4672_v11 }
 0x209   : > { %3287 = vmatprep.subr.bf16.mxu0 %v3800_v62 }
 0x20c   : > { %1758 = vmatmul.mubr.bf16.vlgmr.msra.gmra.mxu1 %v4732_v17  ;;  %3288 = vmatpush3.bf16.msra.mxu0 %v3802_v37  ;;  %v3806_v17 = vld [vmem:[#allocation10 + $0x218] sm:$0xff]  }
 0x20d   : > { %3470 = vmatpush3.bf16.msra.mxu1 %v4767_v44  ;;  %1765 = vmatprep.mubr.bf16.mxu1 %v4612_v55  ;;  %v3807_v55 = vld [vmem:[#allocation10 + $0x210] sm:$0xff]   ;;  %v3808_v44 = vld [vmem:[#allocation10 + $0x208] sm:$0xff]  }
 0x20e   : > { %3471 = vmatprep.subr.bf16.mxu1 %v3803_v63 }
 0x20f   : > { %2164 = vmatmul.mubr.bf16.vlgmr.msra.gmra.mxu0 %v4634_v5 }
 0x210   : > { %2171 = vmatprep.mubr.bf16.mxu0 %v4693_v35 }
 0x211   : > { %3472 = vmatpush3.bf16.msra.mxu1 %v3803_v63 }
 0x212   : > { %3473 = vmatprep.subr.bf16.mxu1 %v3804_v0 }
 0x214   : > { %1766 = vmatmul.mubr.bf16.gmra.mxu1 %v4593_v18  ;;  %v3809_v18 = vld [vmem:[#allocation10 + $0x200] sm:$0xff]  }
 0x215   : > { %1773 = vmatprep.mubr.bf16.mxu1 %v4672_v11  ;;  %3474 = vmatpush3.bf16.msra.mxu1 %v3804_v0 }
 0x216   : > { %3475 = vmatprep.subr.bf16.mxu1 %v3805_v4 }
 0x217   : > { %2172 = vmatmul.mubr.bf16.gmra.mxu0 %v4620_v58 }
 0x218   : > { %2179 = vmatprep.mubr.bf16.mxu0 %v4735_v19 }
 0x219   : > { %3476 = vmatpush3.bf16.msra.mxu1 %v3805_v4 }
 0x21a   : > { %3477 = vmatprep.subr.bf16.mxu1 %v3806_v17 }
 0x21c   : > { %1774 = vmatmul.mubr.bf16.gmra.mxu1 %v4634_v5  ;;  %v3811_v5 = vld [vmem:[#allocation11 + $0x30] sm:$0xff]  }
 0x21d   : > { %1781 = vmatprep.mubr.bf16.mxu1 %v4693_v35  ;;  %3478 = vmatpush3.bf16.msra.mxu1 %v3806_v17 }
 0x21e   : > { %3479 = vmatprep.subr.bf16.mxu1 %v3807_v55 }
 0x21f   : > { %2180 = vmatmul.mubr.bf16.gmra.mxu0 %v4664_v60 }
 0x220   : > { %2187 = vmatprep.mubr.bf16.mxu0 %v4771_v47 }
 0x221   : > { %3480 = vmatpush3.bf16.msra.mxu1 %v3807_v55 }
 0x222   : > { %3481 = vmatprep.subr.bf16.mxu1 %v3808_v44 }
 0x224   : > { %1782 = vmatmul.mubr.bf16.gmra.mxu1 %v4620_v58  ;;  %v3810_v58 = vld [vmem:[#allocation11 + $0x38] sm:$0xff]  }
 0x225   : > { %1789 = vmatprep.mubr.bf16.mxu1 %v4735_v19  ;;  %3482 = vmatpush3.bf16.msra.mxu1 %v3808_v44 }
 0x226   : > { %3483 = vmatprep.subr.bf16.mxu1 %v3809_v18  ;;  %3501 = vmatprep.subr.bf16.mxu0 %v3810_v58 }
 0x227   : > { %2188 = vmatmul.mubr.bf16.gmra.mxu0 %v4659_v40 }
 0x228   : > { %2195 = vmatprep.mubr.bf16.mxu0 %v4793_v7  ;;  %3502 = vmatpush3.bf16.msra.mxu0 %v3810_v58 }
 0x229   : > { %3484 = vmatpush3.bf16.msra.mxu1 %v3809_v18  ;;  %3503 = vmatprep.subr.bf16.mxu0 %v3811_v5 }
 0x22a   : > { %3533 = vmatprep.subr.bf16.mxu1 %v3810_v58 }
 0x22c   : > { %1790 = vmatmul.mubr.bf16.gmra.mxu1 %v4664_v60  ;;  %3504 = vmatpush3.bf16.msra.mxu0 %v3811_v5 }
 0x22d   : > { %1797 = vmatprep.mubr.bf16.mxu1 %v4771_v47  ;;  %v3814_v47 = vld [vmem:[#allocation11 + $0x18] sm:$0xff]  }
 0x22f   : > { %2196 = vmatmul.mubr.bf16.gmra.mxu0 %v4701_v38 }
 0x230   : > { %2203 = vmatprep.mubr.bf16.mxu0 %v4805_v9 }
 0x234   : > { %1798 = vmatmul.mubr.bf16.gmra.mxu1 %v4659_v40 }
 0x235   : > { %1805 = vmatprep.mubr.bf16.mxu1 %v4793_v7 }
 0x237   : > { %2204 = vmatmul.mubr.bf16.gmra.mxu0 %v4685_v28 }
 0x238   : > { %2211 = vmatprep.mubr.bf16.mxu0 %v4815_v24 }
 0x23c   : > { %1806 = vmatmul.mubr.bf16.gmra.mxu1 %v4701_v38 }
 0x23d   : > { %1813 = vmatprep.mubr.bf16.mxu1 %v4805_v9 }
 0x23f   : > { %2212 = vmatmul.mubr.bf16.gmra.mxu0 %v4744_v23 }
 0x240   : > { %2219 = vmatprep.mubr.bf16.mxu0 %v4798_v2 }
 0x244   : > { %1814 = vmatmul.mubr.bf16.gmra.mxu1 %v4685_v28 }
 0x245   : > { %3485 = vmatprep.mubr.bf16.mxu1 %v4644_v25 }
 0x247   : > { %2220 = vmatmul.mubr.bf16.gmra.mxu0 %v4740_v22 }
 0x24c   : > { %3486 = vmatmul.mubr.bf16.vlgmr.msra.gmra.mxu1 %v4647_v26  ;;  %v3812_v26 = vld [vmem:[#allocation11 + $0x28] sm:$0xff]  }
 0x24d   : > { %3489 = vmatprep.mubr.bf16.mxu1 %v4696_v36  ;;  %3541 = vmatpush3.bf16.msra.mxu1 %v3810_v58 }
 0x24e   : > { %3534 = vmatprep.subr.bf16.mxu1 %v3811_v5  ;;  %3505 = vmatprep.subr.bf16.mxu0 %v3812_v26 }
 0x24f   : > { %3506 = vmatpush3.bf16.msra.mxu0 %v3812_v26 }
 0x251   : > { %3542 = vmatpush3.bf16.msra.mxu1 %v3811_v5 }
 0x252   : > { %3535 = vmatprep.subr.bf16.mxu1 %v3812_v26 }
 0x254   : > { %3490 = vmatmul.mubr.bf16.gmra.mxu1 %v4712_v53  ;;  %v3813_v53 = vld [vmem:[#allocation11 + $0x20] sm:$0xff]  }
 0x255   : > { %3493 = vmatprep.mubr.bf16.mxu1 %v4726_v13  ;;  %3543 = vmatpush3.bf16.msra.mxu1 %v3812_v26 }
 0x256   : > { %3507 = vmatprep.subr.bf16.mxu0 %v3813_v53  ;;  %3536 = vmatprep.subr.bf16.mxu1 %v3813_v53 }
 0x257   : > { %3508 = vmatpush3.bf16.msra.mxu0 %v3813_v53 }
 0x258   : > { %3509 = vmatprep.subr.bf16.mxu0 %v3814_v47 }
 0x259   : > { %3544 = vmatpush3.bf16.msra.mxu1 %v3813_v53 }
 0x25a   : > { %3537 = vmatprep.subr.bf16.mxu1 %v3814_v47 }
 0x25b   : > { %3510 = vmatpush3.bf16.msra.mxu0 %v3814_v47 }
 0x25c   : > { %3494 = vmatmul.mubr.bf16.gmra.mxu1 %v4753_v30  ;;  %3511 = vmatprep.subr.bf16.mxu0 %v3815_v14 }
 0x25d   : > { %3497 = vmatprep.mubr.bf16.mxu1 %v4774_v27  ;;  %3545 = vmatpush3.bf16.msra.mxu1 %v3814_v47 }
 0x25e   : > { %3538 = vmatprep.subr.bf16.mxu1 %v3815_v14 }
 0x25f   : > { %3512 = vmatpush3.bf16.msra.mxu0 %v3815_v14 }
 0x260   : > { %3513 = vmatprep.subr.bf16.mxu0 %v3816_v29 }
 0x261   : > { %3546 = vmatpush3.bf16.msra.mxu1 %v3815_v14 }
 0x262   : > { %3539 = vmatprep.subr.bf16.mxu1 %v3816_v29 }
 0x263   : > { %3514 = vmatpush3.bf16.msra.mxu0 %v3816_v29 }
 0x264   : > { %3498 = vmatmul.mubr.bf16.gmra.mxu1 %v4789_v6  ;;  %3515 = vmatprep.subr.bf16.mxu0 %v3817_v39 }
 0x265   : > { %3547 = vmatpush3.bf16.msra.mxu1 %v3816_v29 }
 0x266   : > { %3540 = vmatprep.subr.bf16.mxu1 %v3817_v39 }
 0x267   : > { %3516 = vmatpush3.bf16.msra.mxu0 %v3817_v39 }
 0x269   : > { %3548 = vmatpush3.bf16.msra.mxu1 %v3817_v39 }
 0x286   : > { %v3129_v25 = vpop.f32.mrf.mxu1 }
 0x288   : > { %v3130_v40 = vpop.f32.mrf.mxu1 }
 0x289   : > { %v3131_v60 = vadd.f32 %v3130_v40, %v3129_v25 }
 0x28a   : > { %v3132_v11 = vpop.f32.mrf.mxu1 }
 0x28b   : > { %v3423_v28 = vpop.f32.mrf.mxu0 }
 0x28c   : > { %v3133_v35 = vpop.f32.mrf.mxu1 }
 0x28d   : > { %v3134_v36 = vadd.f32 %v3133_v35, %v3132_v11  ;;  %v1518_v38 = vpop.f32.mrf.mxu0 }
 0x28e   : > { %v4865_v13 = vadd.f32 %v3131_v60, %v1518_v38 }
 0x28f   : > { %v3424_v19 = vpop.f32.mrf.mxu0 }
 0x291   : > { %v1521_v22 = vpop.f32.mrf.mxu0 }
 0x292   : > { %v4867_v23 = vadd.f32 %v3134_v36, %v1521_v22 }
 0x294   : > { %v3135_v30 = vpop.f32.mrf.mxu1 }
 0x296   : > { %v3136_v27 = vpop.f32.mrf.mxu1 }
 0x297   : > { %v3137_v6 = vadd.f32 %v3136_v27, %v3135_v30  ;;  %v3427_v7 = vpop.f32.mrf.mxu0 }
 0x298   : > { %v3138_v8 = vpop.f32.mrf.mxu1 }
 0x299   : > { %v4869_v10 = vadd.f32 %v3423_v28, %v3137_v6  ;;  %v1534_v12 = vpop.f32.mrf.mxu0 }
 0x29a   : > { %v3139_v16 = vpop.f32.mrf.mxu1 }
 0x29b   : > { %v3140_v2 = vadd.f32 %v3139_v16, %v3138_v8  ;;  %v3428_v20 = vpop.f32.mrf.mxu0 }
 0x29c   : > { %v3141_v21 = vpop.f32.mrf.mxu1 }
 0x29d   : > { %v4871_v52 = vadd.f32 %v3424_v19, %v3140_v2  ;;  %v1537_v56 = vpop.f32.mrf.mxu0 }
 0x29e   : > { %v3142_v9 = vpop.f32.mrf.mxu1 }
 0x29f   : > { %v3143_v45 = vadd.f32 %v3142_v9, %v3141_v21  ;;  %v3431_v31 = vpop.f32.mrf.mxu0 }
 0x2a0   : > { %v3144_v34 = vpop.f32.mrf.mxu1 }
 0x2a1   : > { %v4873_v32 = vadd.f32 %v3143_v45, %v1534_v12  ;;  %v1550_v33 = vpop.f32.mrf.mxu0 }
 0x2a2   : > { %v3145_v15 = vpop.f32.mrf.mxu1 }
 0x2a3   : > { %v3146_v3 = vadd.f32 %v3145_v15, %v3144_v34  ;;  %v3432_v41 = vpop.f32.mrf.mxu0 }
 0x2a4   : > { %v3147_v43 = vpop.f32.mrf.mxu1 }
 0x2a5   : > { %v4875_v24 = vadd.f32 %v3146_v3, %v1537_v56  ;;  %v1553_v48 = vpop.f32.mrf.mxu0 }
 0x2a6   : > { %v3148_v42 = vpop.f32.mrf.mxu1 }
 0x2a7   : > { %v3149_v46 = vadd.f32 %v3148_v42, %v3147_v43  ;;  %v3435_v49 = vpop.f32.mrf.mxu0 }
 0x2a8   : > { %v3150_v50 = vpop.f32.mrf.mxu1 }
 0x2a9   : > { %v4877_v51 = vadd.f32 %v3427_v7, %v3149_v46  ;;  %v1566_v54 = vpop.f32.mrf.mxu0 }
 0x2aa   : > { %v3151_v57 = vpop.f32.mrf.mxu1 }
 0x2ab   : > { %v3152_v59 = vadd.f32 %v3151_v57, %v3150_v50  ;;  %v3436_v61 = vpop.f32.mrf.mxu0 }
 0x2ac   : > { %v3153_v1 = vpop.f32.mrf.mxu1 }
 0x2ad   : > { %v4879_v62 = vadd.f32 %v3428_v20, %v3152_v59  ;;  %v1569_v37 = vpop.f32.mrf.mxu0 }
 0x2ae   : > { %v3154_v63 = vpop.f32.mrf.mxu1 }
 0x2af   : > { %v3155_v0 = vadd.f32 %v3154_v63, %v3153_v1  ;;  %v4881_v4 = vpop.f32.mrf.mxu0 }
 0x2b0   : > { %v3156_v17 = vpop.f32.mrf.mxu1 }
 0x2b1   : > { %v4883_v55 = vadd.f32 %v3155_v0, %v1550_v33  ;;  %v1856_v44 = vpop.f32.mrf.mxu0 }
 0x2b2   : > { %v3157_v18 = vpop.f32.mrf.mxu1 }
 0x2b3   : > { %v3158_v58 = vadd.f32 %v3157_v18, %v3156_v17  ;;  %v4885_v5 = vpop.f32.mrf.mxu0 }
 0x2b4   : > { %v3159_v25 = vpop.f32.mrf.mxu1 }
 0x2b5   : > { %v4887_v26 = vadd.f32 %v3158_v58, %v1553_v48  ;;  %v1859_v40 = vpop.f32.mrf.mxu0 }
 0x2b6   : > { %v3160_v60 = vpop.f32.mrf.mxu1 }
 0x2b7   : > { %v3161_v11 = vadd.f32 %v3160_v60, %v3159_v25  ;;  %v4889_v28 = vpop.f32.mrf.mxu0 }
 0x2b8   : > { %v3162_v35 = vpop.f32.mrf.mxu1 }
 0x2b9   : > { %v4891_v36 = vadd.f32 %v3431_v31, %v3161_v11  ;;  %v4893_v38 = vpop.f32.mrf.mxu0 }
 0x2ba   : > { %v3163_v53 = vpop.f32.mrf.mxu1 }
 0x2bb   : > { %v3164_v19 = vadd.f32 %v3163_v53, %v3162_v35  ;;  %v4895_v22 = vpop.f32.mrf.mxu0 }
 0x2bc   : > { %v3165_v30 = vpop.f32.mrf.mxu1 }
 0x2bd   : > { %v4897_v47 = vadd.f32 %v3432_v41, %v3164_v19  ;;  %v4899_v27 = vpop.f32.mrf.mxu0 }
 0x2be   : > { %v3166_v6 = vpop.f32.mrf.mxu1 }
 0x2bf   : > { %v3167_v7 = vadd.f32 %v3166_v6, %v3165_v30  ;;  %v4901_v8 = vpop.f32.mrf.mxu0 }
 0x2c0   : > { %v3168_v12 = vpop.f32.mrf.mxu1 }
 0x2c1   : > { %v4903_v14 = vadd.f32 %v3167_v7, %v1566_v54  ;;  %v4905_v16 = vpop.f32.mrf.mxu0 }
 0x2c2   : > { %v3169_v2 = vpop.f32.mrf.mxu1 }
 0x2c3   : > { %v3170_v20 = vadd.f32 %v3169_v2, %v3168_v12  ;;  %v4907_v21 = vpop.f32.mrf.mxu0 }
 0x2c4   : > { %v3171_v56 = vpop.f32.mrf.mxu1 }
 0x2c5   : > { %v4909_v29 = vadd.f32 %v3170_v20, %v1569_v37  ;;  %v4911_v9 = vpop.f32.mrf.mxu0 }
 0x2c6   : > { %v3172_v45 = vpop.f32.mrf.mxu1 }
 0x2c7   : > { %v3173_v31 = vadd.f32 %v3172_v45, %v3171_v56  ;;  %v4913_v34 = vpop.f32.mrf.mxu0 }
 0x2c8   : > { %v3174_v33 = vpop.f32.mrf.mxu1 }
 0x2c9   : > { %v4915_v15 = vadd.f32 %v3435_v49, %v3173_v31  ;;  %v4917_v39 = vpop.f32.mrf.mxu0 }
 0x2ca   : > { %v3175_v3 = vpop.f32.mrf.mxu1 }
 0x2cb   : > { %v3176_v41 = vadd.f32 %v3175_v3, %v3174_v33  ;;  %v4919_v43 = vpop.f32.mrf.mxu0 }
 0x2cc   : > { %v3209_v48 = vpop.f32.mrf.mxu1 }
 0x2cd   : > { %v4921_v42 = vadd.f32 %v3436_v61, %v3176_v41  ;;  %v4923_v46 = vpop.f32.mrf.mxu0 }
 0x2ce   : > { %v3210_v50 = vpop.f32.mrf.mxu1 }
 0x2cf   : > { %v3211_v54 = vadd.f32 %v3210_v50, %v3209_v48  ;;  %v4925_v57 = vpop.f32.mrf.mxu0 }
 0x2d0   : > { %v3212_v59 = vpop.f32.mrf.mxu1 }
 0x2d1   : > { %v1760_v1 = vadd.f32 %v3211_v54, %v4865_v13  ;;  %v4928_v49 = vpop.f32.mrf.mxu0 }
 0x2d2   : > { %v3213_v37 = vpop.f32.mrf.mxu1 }
 0x2d3   : > { %v3214_v63 = vadd.f32 %v3213_v37, %v3212_v59  ;;  %v4930_v0 = vpop.f32.mrf.mxu0  ;;  %v4932_v17 = vadd.f32 %v1856_v44, %v1760_v1 }
 0x2d4   : > { %v3215_v18 = vpop.f32.mrf.mxu1 }
 0x2d5   : > { %v1763_v61 = vadd.f32 %v3214_v63, %v4867_v23  ;;  %v4935_v58 = vpop.f32.mrf.mxu0 }
 0x2d6   : > { %v3216_v25 = vpop.f32.mrf.mxu1 }
 0x2d7   : > { %v3217_v60 = vadd.f32 %v3216_v25, %v3215_v18  ;;  %v4937_v11 = vpop.f32.mrf.mxu0  ;;  %v4939_v35 = vadd.f32 %v1859_v40, %v1763_v61 }
 0x2d8   : > { %v3218_v13 = vpop.f32.mrf.mxu1 }
 0x2d9   : > { %v1768_v53 = vadd.f32 %v3217_v60, %v4869_v10  ;;  %v4942_v19 = vpop.f32.mrf.mxu0 }
 0x2da   : > { %v3219_v30 = vpop.f32.mrf.mxu1 }
 0x2db   : > { %v3220_v6 = vadd.f32 %v3219_v30, %v3218_v13  ;;  %v4944_v44 = vpop.f32.mrf.mxu0  ;;  %v4947_v7 = vadd.f32 %v4881_v4, %v1768_v53 }
 0x2dc   : > { %v3221_v23 = vpop.f32.mrf.mxu1 }
 0x2dd   : > { %v1771_v12 = vadd.f32 %v3220_v6, %v4871_v52  ;;  %v4950_v2 = vpop.f32.mrf.mxu0 }
 0x2de   : > { %v3222_v20 = vpop.f32.mrf.mxu1 }
 0x2df   : > { %v3223_v40 = vadd.f32 %v3222_v20, %v3221_v23  ;;  %v4952_v56 = vpop.f32.mrf.mxu0  ;;  %v4955_v10 = vadd.f32 %v4885_v5, %v1771_v12 }
 0x2e0   : > { %v3224_v45 = vpop.f32.mrf.mxu1 }
 0x2e1   : > { %v1776_v31 = vadd.f32 %v3223_v40, %v4873_v32  ;;  %v4958_v33 = vpop.f32.mrf.mxu0 }
 0x2e2   : > { %v3225_v3 = vpop.f32.mrf.mxu1 }
 0x2e3   : > { %v3226_v4 = vadd.f32 %v3225_v3, %v3224_v45  ;;  %v4960_v41 = vpop.f32.mrf.mxu0  ;;  %v4963_v52 = vadd.f32 %v4893_v38, %v1776_v31 }
 0x2e4   : > { %v3227_v48 = vpop.f32.mrf.mxu1 }
 0x2e5   : > { %v1779_v50 = vadd.f32 %v3226_v4, %v4875_v24  ;;  %v4966_v54 = vpop.f32.mrf.mxu0 }
 0x2e6   : > { %v3228_v59 = vpop.f32.mrf.mxu1 }
 0x2e7   : > { %v3229_v5 = vadd.f32 %v3228_v59, %v3227_v48  ;;  %v4968_v1 = vpop.f32.mrf.mxu0  ;;  %v4971_v32 = vadd.f32 %v4899_v27, %v1779_v50 }
 0x2e8   : > { %v3230_v37 = vpop.f32.mrf.mxu1 }
 0x2e9   : > { %v1784_v63 = vadd.f32 %v3229_v5, %v4877_v51  ;;  %v4974_v18 = vpop.f32.mrf.mxu0 }
 0x2ea   : > { %v3231_v61 = vpop.f32.mrf.mxu1 }
 0x2eb   : > { %v3232_v38 = vadd.f32 %v3231_v61, %v3230_v37  ;;  %v4976_v25 = vpop.f32.mrf.mxu0  ;;  %v4979_v24 = vadd.f32 %v4889_v28, %v1784_v63 }
 0x2ec   : > { %v3233_v60 = vpop.f32.mrf.mxu1 }
 0x2ed   : > { %v1787_v13 = vadd.f32 %v3232_v38, %v4879_v62  ;;  %v4982_v53 = vpop.f32.mrf.mxu0 }
 0x2ee   : > { %v3234_v30 = vpop.f32.mrf.mxu1 }
 0x2ef   : > { %v3235_v27 = vadd.f32 %v3234_v30, %v3233_v60  ;;  %v4984_v6 = vpop.f32.mrf.mxu0  ;;  %v4987_v51 = vadd.f32 %v4895_v22, %v1787_v13 }
 0x2f0   : > { %v3236_v23 = vpop.f32.mrf.mxu1 }
 0x2f1   : > { %v1792_v12 = vadd.f32 %v3235_v27, %v4883_v55  ;;  %v4990_v20 = vpop.f32.mrf.mxu0 }
 0x2f2   : > { %v3237_v40 = vpop.f32.mrf.mxu1 }
 0x2f3   : > { %v3238_v28 = vadd.f32 %v3237_v40, %v3236_v23  ;;  %v4992_v45 = vpop.f32.mrf.mxu0  ;;  %v4995_v62 = vadd.f32 %v4905_v16, %v1792_v12 }
 0x2f4   : > { %v3239_v31 = vpop.f32.mrf.mxu1 }
 0x2f5   : > { %v1795_v3 = vadd.f32 %v3238_v28, %v4887_v26  ;;  %v4998_v4 = vpop.f32.mrf.mxu0 }
 0x2f6   : > { %v3240_v48 = vpop.f32.mrf.mxu1 }
 0x2f7   : > { %v3241_v22 = vadd.f32 %v3240_v48, %v3239_v31  ;;  %v5000_v50 = vpop.f32.mrf.mxu0  ;;  %v5003_v55 = vadd.f32 %v4911_v9, %v1795_v3 }
 0x2f8   : > { %v3242_v59 = vpop.f32.mrf.mxu1 }
 0x2f9   : > { %v1800_v5 = vadd.f32 %v3241_v22, %v4891_v36  ;;  %v5006_v63 = vpop.f32.mrf.mxu0 }
 0x2fa   : > { %v3243_v37 = vpop.f32.mrf.mxu1 }
 0x2fb   : > { %v3244_v16 = vadd.f32 %v3243_v37, %v3242_v59  ;;  %v5009_v61 = vadd.f32 %v4901_v8, %v1800_v5  ;;  %v5012_v13 = vpop.f32.mrf.mxu0  ;;  %v3291_v5 = vadd.f32 %v4928_v49, %v4925_v57 }
 0x2fc   : > { %v3245_v26 = vpop.f32.mrf.mxu1 }
 0x2fd   : > { %v1803_v38 = vadd.f32 %v3244_v16, %v4897_v47  ;;  %v5018_v12 = vpop.f32.mrf.mxu0  ;;  %v3300_v16 = vadd.f32 %v4950_v2, %v4944_v44  ;;  %v3309_v44 = vadd.f32 %v4974_v18, %v4968_v1 }
 0x2fe   : > { %v3246_v60 = vpop.f32.mrf.mxu1 }
 0x2ff   : > { %v3247_v30 = vadd.f32 %v3246_v60, %v3245_v26  ;;  %v5015_v9 = vadd.f32 %v4907_v21, %v1803_v38  ;;  %v5024_v3 = vpop.f32.mrf.mxu0  ;;  %v3294_v60 = vadd.f32 %v4935_v58, %v4930_v0 }
 0x300   : > { %v3248_v27 = vpop.f32.mrf.mxu1 }
 0x301   : > { %v1808_v36 = vadd.f32 %v3247_v30, %v4903_v14  ;;  %v3297_v14 = vadd.f32 %v4942_v19, %v4937_v11  ;;  %v5035_v59 = vpop.f32.mrf.mxu0  ;;  %v5047_v11 = vld [vmem:[%s5341_s24] ss:$0 sm:$0xff] }
 0x302   : > { %v3249_v23 = vpop.f32.mrf.mxu1 }
 0x303   : > { %v3250_v40 = vadd.f32 %v3249_v23, %v3248_v27  ;;  %v5021_v8 = vadd.f32 %v4917_v39, %v1808_v36  ;;  %v3303_v23 = vadd.f32 %v4958_v33, %v4952_v56 }
 0x304   : > { %v3251_v28 = vpop.f32.mrf.mxu1 }
 0x305   : > { %v1811_v47 = vadd.f32 %v3250_v40, %v4909_v29 }
 0x306   : > { %v3252_v31 = vpop.f32.mrf.mxu1 }
 0x307   : > { %v5027_v48 = vadd.f32 %v4923_v46, %v1811_v47  ;;  %v5041_v46 = vpop.f32.mrf.mxu0 }
 0x308   : > { %v5029_v21 = vpop.f32.mrf.mxu1 }
 0x309   : > { %v5054_v2 = vpop.f32.mrf.mxu0 }
 0x30a   : > { %v5031_v22 = vpop.f32.mrf.mxu1 }
 0x30b   : > { %v3331_v1 = vpop.f32.mrf.mxu0 }
 0x30c   : > { %v3487_v39 = vpop.f32.mrf.mxu1 }
 0x30d   : > { %v2271_v29 = vadd.f32 %v3487_v39, %v3297_v14 }
 0x30e   : > { %v2262_v37 = vpop.f32.mrf.mxu1 }
 0x30f   : > { %v2327_v26 = vadd.f32 %v2271_v29, %v4947_v7  ;;  %v2263_v38 = vadd.f32 %v3291_v5, %v2262_v37  ;;  %v3306_v37 = vadd.f32 %v4966_v54, %v4960_v41  ;;  %v3315_v41 = vadd.f32 %v4990_v20, %v4984_v6 }
 0x310   : > { %v3488_v19 = vpop.f32.mrf.mxu1 }
 0x311   : > { %v2325_v57 = vadd.f32 %v2263_v38, %v4932_v17  ;;  %v2274_v49 = vadd.f32 %v3488_v19, %v3300_v16  ;;  %v2350_v7 = vadd.f32 %v5047_v11, %v2327_v26 }
 0x312   : > { %v2265_v30 = vpop.f32.mrf.mxu1 }
 0x313   : > { %v2328_v27 = vadd.f32 %v2274_v49, %v4955_v10  ;;  %v2266_v36 = vadd.f32 %v3294_v60, %v2265_v30  ;;  %v2348_v0 = vadd.f32 %v5047_v11, %v2325_v57  ;;  %v2366_v18 = vmax.f32 %v2350_v7, 0.0  ;;  %v3332_v49 = vpop.f32.mrf.mxu0 }
 0x314   : > { %v3491_v40 = vpop.f32.mrf.mxu1  ;;  %v3312_v10 = vadd.f32 %v4982_v53, %v4976_v25  ;;  %v3321_v57 = vadd.f32 %v5006_v63, %v5000_v50  ;;  %v3253_v25 = vadd.f32 %v3252_v31, %v3251_v28  ;;  %v3324_v28 = vadd.f32 %v5018_v12, %v5012_v13 }
 0x315   : > { %v2351_v17 = vadd.f32 %v5047_v11, %v2328_v27  ;;  %v2326_v58 = vadd.f32 %v2266_v36, %v4939_v35  ;;  %v2287_v47 = vadd.f32 %v3491_v40, %v3309_v44  ;;  %v2364_v16 = vmax.f32 %v2348_v0, 0.0  ;;  %v3334_v31 = vpop.f32.mrf.mxu0 }
 0x316   : > { %v2278_v14 = vpop.f32.mrf.mxu1  ;;  %v3318_v0 = vadd.f32 %v4998_v4, %v4992_v45 }
 0x317   : > { %v2367_v39 = vmax.f32 %v2351_v17, 0.0  ;;  %v2349_v5 = vadd.f32 %v5047_v11, %v2326_v58  ;;  %v2279_v29 = vadd.f32 %v3303_v23, %v2278_v14  ;;  %v2331_v56 = vadd.f32 %v2287_v47, %v4979_v24 }
 0x318   : > { %v3492_v33 = vpop.f32.mrf.mxu1  ;;  %v1816_v23 = vadd.f32 %v3253_v25, %v4915_v15  ;;  %v3256_v17 = vadd.f32 %v5031_v22, %v5029_v21  ;;  %v3335_v15 = vpop.f32.mrf.mxu0 }
 0x319   : > { %v2381_v26 = vpack.c.bf16 %v2367_v39, %v2366_v18  ;;  %v2365_v35 = vmax.f32 %v2349_v5, 0.0  ;;  %v2329_v38 = vadd.f32 %v2279_v29, %v4963_v52  ;;  %v2290_v19 = vadd.f32 %v3492_v33, %v3312_v10 }
 0x31a   : > { %v2281_v60 = vpop.f32.mrf.mxu1  ;;  %v2354_v24 = vadd.f32 %v5047_v11, %v2331_v56  ;;  %v3333_v39 = vadd.f32 %v3332_v49, %v3331_v1  ;;  %v1913_v4 = vadd.f32 %v4913_v34, %v1816_v23  ;;  %v1819_v10 = vadd.f32 %v3256_v17, %v4921_v42  ;;  %v3827_v23 = vld [vmem:[%s4524_s1] sm:$0xff]  }
 0x31b   : > { %v2282_v30 = vadd.f32 %v3306_v37, %v2281_v60  ;;  %v2380_v44 = vpack.c.bf16 %v2365_v35, %v2364_v16  ;;  %v2332_v53 = vadd.f32 %v2290_v19, %v4987_v51  ;;  %v2352_v27 = vadd.f32 %v5047_v11, %v2329_v38 }
 0x31c   : > { %v3495_v7 = vpop.f32.mrf.mxu1  ;;  %v2370_v6 = vmax.f32 %v2354_v24, 0.0  ;;  %v3336_v33 = vadd.f32 %v3335_v15, %v3334_v31  ;;  %v3330_v34 = vadd.f32 %v5054_v2, %v5041_v46  ;;  %v1916_v19 = vadd.f32 %v4919_v43, %v1819_v10  ;;  %v3826_v31 = vld [vmem:[%s4524_s1 + $0x8] sm:$0xff]  }
 0x31d   : > { %v2330_v54 = vadd.f32 %v2282_v30, %v4971_v32  ;;  %v2303_v52 = vadd.f32 %v3495_v7, %v3321_v57  ;;  %3517 = vmatprep.mubr.bf16.mxu0 %v2380_v44  ;;  %v2355_v50 = vadd.f32 %v5047_v11, %v2332_v53  ;;  %v2368_v13 = vmax.f32 %v2352_v27, 0.0 }
 0x31e   : > { %v2294_v63 = vpop.f32.mrf.mxu1  ;;  %3518 = vmatmul.mubr.bf16.vlgmr.msra.gmra.mxu0 %v2381_v26  ;;  %v2557_v17 = vunpack.c.h.bf16 %v3827_v23 }
 0x31f   : > { %v2353_v51 = vadd.f32 %v5047_v11, %v2330_v54  ;;  %v2295_v36 = vadd.f32 %v3315_v41, %v2294_v63  ;;  %v2371_v20 = vmax.f32 %v2355_v50, 0.0  ;;  %v2335_v32 = vadd.f32 %v2303_v52, %v5009_v61  ;;  %v5111_v63 = vld [vmem:[%s5342_s8] ss:$0 sm:$0xff] }
 0x320   : > { %v3496_v40 = vpop.f32.mrf.mxu1  ;;  %v3327_v61 = vadd.f32 %v5035_v59, %v5024_v3 }
 0x321   : > { %v2369_v58 = vmax.f32 %v2353_v51, 0.0  ;;  %v2306_v47 = vadd.f32 %v3496_v40, %v3324_v28  ;;  %v2383_v12 = vpack.c.bf16 %v2371_v20, %v2370_v6  ;;  %v2333_v14 = vadd.f32 %v2295_v36, %v4995_v62 }
 0x322   : > { %v2297_v18 = vpop.f32.mrf.mxu1  ;;  %v2358_v45 = vadd.f32 %v5047_v11, %v2335_v32  ;;  %v2558_v51 = vunpack.c.l.bf16 %v3826_v31  ;;  %v2556_v6 = vunpack.c.l.bf16 %v3827_v23  ;;  %v2559_v20 = vunpack.c.h.bf16 %v3826_v31 }
 0x323   : > { %v2336_v5 = vadd.f32 %v2306_v47, %v5015_v9  ;;  %v2298_v29 = vadd.f32 %v3318_v0, %v2297_v18  ;;  %v2382_v22 = vpack.c.bf16 %v2369_v58, %v2368_v13  ;;  %v2356_v9 = vadd.f32 %v5047_v11, %v2333_v14 }
 0x324   : > { %v3499_v21 = vpop.f32.mrf.mxu1  ;;  %v2374_v42 = vmax.f32 %v2358_v45, 0.0 }
 0x325   : > { %v2359_v56 = vadd.f32 %v5047_v11, %v2336_v5  ;;  %v2334_v62 = vadd.f32 %v2298_v29, %v5003_v55  ;;  %v2319_v1 = vadd.f32 %v3499_v21, %v3333_v39  ;;  %3521 = vmatprep.mubr.bf16.mxu1 %v2382_v22  ;;  %v2372_v57 = vmax.f32 %v2356_v9, 0.0  ;;  %v3828_v29 = vld [vmem:[%s4524_s1 + $0x18] sm:$0xff]  }
 0x326   : > { %v2310_v37 = vpop.f32.mrf.mxu1  ;;  %3522 = vmatmul.mubr.bf16.vlgmr.msra.gmra.mxu1 %v2383_v12 }
 0x327   : > { %v2375_v16 = vmax.f32 %v2359_v56, 0.0  ;;  %v2357_v3 = vadd.f32 %v5047_v11, %v2334_v62  ;;  %v2339_v59 = vadd.f32 %v2319_v1, %v1913_v4  ;;  %v2311_v26 = vadd.f32 %v3327_v61, %v2310_v37  ;;  %v3829_v56 = vld [vmem:[%s4524_s1 + $0x10] sm:$0xff]  }
 0x328   : > { %v3500_v35 = vpop.f32.mrf.mxu1  ;;  %v2562_v61 = vunpack.c.l.bf16 %v3828_v29  ;;  %v2560_v62 = vunpack.c.l.bf16 %v3829_v56  ;;  %v2563_v1 = vunpack.c.h.bf16 %v3828_v29 }
 0x329   : > { %v2373_v38 = vmax.f32 %v2357_v3, 0.0  ;;  %v2337_v55 = vadd.f32 %v2311_v26, %v5021_v8  ;;  %v2322_v60 = vadd.f32 %v3500_v35, %v3336_v33  ;;  %v2385_v30 = vpack.c.bf16 %v2375_v16, %v2374_v42 }
 0x32a   : > { %v2313_v49 = vpop.f32.mrf.mxu1  ;;  %v2362_v44 = vadd.f32 %v5047_v11, %v2339_v59  ;;  %v2561_v3 = vunpack.c.h.bf16 %v3829_v56 }
 0x32b   : > { %v2340_v25 = vadd.f32 %v2322_v60, %v1916_v19  ;;  %v2314_v24 = vadd.f32 %v3330_v34, %v2313_v49  ;;  %v2384_v53 = vpack.c.bf16 %v2373_v38, %v2372_v57  ;;  %v2360_v7 = vadd.f32 %v5047_v11, %v2337_v55  ;;  %v3830_v38 = vld [vmem:[%s4524_s1 + $0x28] sm:$0xff]  }
 0x32c   : > { %v2378_v8 = vmax.f32 %v2362_v44, 0.0  ;;  %v2566_v55 = vunpack.c.l.bf16 %v3830_v38  ;;  %v3831_v44 = vld [vmem:[%s4524_s1 + $0x20] sm:$0xff]  }
 0x32d   : > { %v2363_v46 = vadd.f32 %v5047_v11, %v2340_v25  ;;  %v2338_v2 = vadd.f32 %v2314_v24, %v5027_v48  ;;  %3525 = vmatprep.mubr.bf16.mxu1 %v2384_v53  ;;  %v2376_v54 = vmax.f32 %v2360_v7, 0.0  ;;  %v2564_v25 = vunpack.c.l.bf16 %v3831_v44 }
 0x32e   : > { %3526 = vmatmul.mubr.bf16.gmra.mxu1 %v2385_v30  ;;  %v2567_v24 = vunpack.c.h.bf16 %v3830_v38 }
 0x32f   : > { %v2379_v41 = vmax.f32 %v2363_v46, 0.0  ;;  %v2361_v43 = vadd.f32 %v5047_v11, %v2338_v2 }
 0x331   : > { %v2377_v52 = vmax.f32 %v2361_v43, 0.0  ;;  %v2387_v27 = vpack.c.bf16 %v2379_v41, %v2378_v8 }
 0x333   : > { %v2386_v50 = vpack.c.bf16 %v2377_v52, %v2376_v54  ;;  %v2565_v52 = vunpack.c.h.bf16 %v3831_v44 }
 0x335   : > { %3529 = vmatprep.mubr.bf16.mxu1 %v2386_v50 }
 0x336   : > { %3530 = vmatmul.mubr.bf16.gmra.mxu1 %v2387_v27 }
 0x3de   : > { %v3519_v28 = vpop.f32.mrf.mxu0 }
 0x3df   : > { %v2502_v48 = vadd.f32 %v3519_v28, %v5111_v63 }
 0x3e0   : > { %v2493_v36 = vpop.f32.mrf.mxu0 }
 0x3e1   : > { %v2494_v11 = vadd.f32 %v5111_v63, %v2493_v36  ;;  %v2574_v40 = vadd.f32 %v2558_v51, %v2502_v48  ;;  %v3832_v51 = vld [vmem:[%s4524_s1 + $0x38] sm:$0xff]  }
 0x3e2   : > { %v3520_v32 = vpop.f32.mrf.mxu0  ;;  %v2570_v36 = vunpack.c.l.bf16 %v3832_v51 }
 0x3e3   : > { %v2505_v0 = vadd.f32 %v3520_v32, %v5111_v63  ;;  %v2572_v47 = vadd.f32 %v2556_v6, %v2494_v11  ;;  %v2590_v14 = vmax.f32 %v2574_v40, 0.0  ;;  %v3833_v40 = vld [vmem:[%s4524_s1 + $0x30] sm:$0xff]   ;;  %s2698_s1 = sadd.s32 %s3047_s18, %s3026_s12 }
 0x3e4   : > { %v2496_v58 = vpop.f32.mrf.mxu0  ;;  %s3027_s9 = sshll.u32 %s2698_s1, 6 }
 0x3e5   : > { %v2575_v13 = vadd.f32 %v2559_v20, %v2505_v0  ;;  %v2497_v12 = vadd.f32 %v5111_v63, %v2496_v58  ;;  %v2588_v45 = vmax.f32 %v2572_v47, 0.0  ;;  %v2568_v0 = vunpack.c.l.bf16 %v3833_v40  ;;  %s5156_s26 = scalar_lea.hbm %s5344_s23, %s3027_s9 }
 0x3e6   : > { %v3523_v15 = vpop.f32.mrf.mxu1 }
 0x3e7   : > { %v2591_v18 = vmax.f32 %v2575_v13, 0.0  ;;  %v2573_v39 = vadd.f32 %v2557_v17, %v2497_v12  ;;  %v2518_v5 = vadd.f32 %v3523_v15, %v5111_v63  ;;  %v2571_v17 = vunpack.c.h.bf16 %v3832_v51 }
 0x3e8   : > { %v2509_v22 = vpop.f32.mrf.mxu1 }
 0x3e9   : > { %v3056_v4 = vpack.c.bf16 %v2591_v18, %v2590_v14  ;;  %v2589_v21 = vmax.f32 %v2573_v39, 0.0  ;;  %v2510_v10 = vadd.f32 %v5111_v63, %v2509_v22  ;;  %v2578_v37 = vadd.f32 %v2562_v61, %v2518_v5 }
 0x3ea   : > { %v3524_v9 = vpop.f32.mrf.mxu1  ;;  %v2569_v5 = vunpack.c.h.bf16 %v3833_v40 }
 0x3eb   : > { %3088 = vst [vmem:[%s5125_s27 + $0x8] sm:$0xff] %v3056_v4   ;;  %v3051_v33 = vpack.c.bf16 %v2589_v21, %v2588_v45  ;;  %v2521_v16 = vadd.f32 %v3524_v9, %v5111_v63  ;;  %v2576_v26 = vadd.f32 %v2560_v62, %v2510_v10  ;;  %v2594_v19 = vmax.f32 %v2578_v37, 0.0 }
 0x3ec   : > { %v2512_v59 = vpop.f32.mrf.mxu1 }
 0x3ed   : > { %3052 = vst [vmem:[%s5125_s27] sm:$0xff] %v3051_v33   ;;  %v2579_v34 = vadd.f32 %v2563_v1, %v2521_v16  ;;  %v2513_v42 = vadd.f32 %v5111_v63, %v2512_v59  ;;  %v2592_v53 = vmax.f32 %v2576_v26, 0.0 }
 0x3ee   : > { %v3527_v35 = vpop.f32.mrf.mxu1 }
 0x3ef   : > { %v2595_v60 = vmax.f32 %v2579_v34, 0.0  ;;  %v2577_v57 = vadd.f32 %v2561_v3, %v2513_v42  ;;  %v2534_v49 = vadd.f32 %v3527_v35, %v5111_v63 }
 0x3f0   : > { %v2525_v30 = vpop.f32.mrf.mxu1 }
 0x3f1   : > { %v3066_v7 = vpack.c.bf16 %v2595_v60, %v2594_v19  ;;  %v2593_v46 = vmax.f32 %v2577_v57, 0.0  ;;  %v2526_v2 = vadd.f32 %v5111_v63, %v2525_v30  ;;  %v2582_v43 = vadd.f32 %v2566_v55, %v2534_v49 }
 0x3f2   : > { %v3528_v8 = vpop.f32.mrf.mxu1 }
 0x3f3   : > { %3090 = vst [vmem:[%s5125_s27 + $0x18] sm:$0xff] %v3066_v7   ;;  %v3061_v41 = vpack.c.bf16 %v2593_v46, %v2592_v53  ;;  %v2537_v54 = vadd.f32 %v3528_v8, %v5111_v63  ;;  %v2580_v50 = vadd.f32 %v2564_v25, %v2526_v2  ;;  %v2598_v11 = vmax.f32 %v2582_v43, 0.0 }
 0x3f4   : > { %v2528_v27 = vpop.f32.mrf.mxu1 }
 0x3f5   : > { %3089 = vst [vmem:[%s5125_s27 + $0x10] sm:$0xff] %v3061_v41   ;;  %v2583_v28 = vadd.f32 %v2567_v24, %v2537_v54  ;;  %v2529_v48 = vadd.f32 %v5111_v63, %v2528_v27  ;;  %v2596_v58 = vmax.f32 %v2580_v50, 0.0 }
 0x3f6   : > { %v3531_v31 = vpop.f32.mrf.mxu1 }
 0x3f7   : > { %v2599_v23 = vmax.f32 %v2583_v28, 0.0  ;;  %v2581_v6 = vadd.f32 %v2565_v52, %v2529_v48  ;;  %v2550_v20 = vadd.f32 %v3531_v31, %v5111_v63 }
 0x3f8   : > { %v2541_v32 = vpop.f32.mrf.mxu1 }
 0x3f9   : > { %v3076_v47 = vpack.c.bf16 %v2599_v23, %v2598_v11  ;;  %v2597_v13 = vmax.f32 %v2581_v6, 0.0  ;;  %v2542_v12 = vadd.f32 %v5111_v63, %v2541_v32  ;;  %v2586_v39 = vadd.f32 %v2570_v36, %v2550_v20 }
 0x3fa   : > { %v3532_v14 = vpop.f32.mrf.mxu1 }
 0x3fb   : > { %3092 = vst [vmem:[%s5125_s27 + $0x28] sm:$0xff] %v3076_v47   ;;  %v3071_v18 = vpack.c.bf16 %v2597_v13, %v2596_v58  ;;  %v2553_v15 = vadd.f32 %v3532_v14, %v5111_v63  ;;  %v2584_v61 = vadd.f32 %v2568_v0, %v2542_v12  ;;  %v2602_v21 = vmax.f32 %v2586_v39, 0.0 }
 0x3fc   : > { %v2544_v29 = vpop.f32.mrf.mxu1 }
 0x3fd   : > { %3091 = vst [vmem:[%s5125_s27 + $0x20] sm:$0xff] %v3071_v18   ;;  %v2587_v45 = vadd.f32 %v2571_v17, %v2553_v15  ;;  %v2545_v4 = vadd.f32 %v5111_v63, %v2544_v29  ;;  %v2600_v56 = vmax.f32 %v2584_v61, 0.0 }
 0x3ff   : > { %v2603_v22 = vmax.f32 %v2587_v45, 0.0  ;;  %v2585_v10 = vadd.f32 %v2569_v5, %v2545_v4 }
 0x401   : > { %v3086_v62 = vpack.c.bf16 %v2603_v22, %v2602_v21  ;;  %v2601_v1 = vmax.f32 %v2585_v10, 0.0 }
 0x403   : > { %3094 = vst [vmem:[%s5125_s27 + $0x38] sm:$0xff] %v3086_v62   ;;  %v3081_v33 = vpack.c.bf16 %v2601_v1, %v2600_v56 }
 0x405   : > { %3093 = vst [vmem:[%s5125_s27 + $0x30] sm:$0xff] %v3081_v33  }
 0x406   : > { %4009 = shalt.err (!%p4006_p4)
}
 0x407   : > { %s4010_s25 = scalar_lea.hbm %s5156_s26, 1024  ;;  %s4014_s19 = scalar_lea.hbm %s5344_s23, 4096 }
 0x408   : > { %p4011_p10 = scmp.ne.s32.totalorder %s5156_s26, %s4010_s25  ;;  %p4015_p3 = scmp.lt.s32.totalorder %s5156_s26, %s5344_s23 }
 0x409   : > { %p4016_p2 = scmp.lt.s32.totalorder %s4014_s19, %s4010_s25 }
 0x40a   : > { %p4012_p5 = pnand %p4011_p10, %p5345_p1 }
 0x40b   : > { %p4017_p9 = por %p4016_p2, %p4015_p3 }
 0x40c   : > { %p4013_p8 = pneg %p4012_p5 }
 0x40e   : > { %p4018_p13 = pnand %p4017_p9, %p4013_p8 }
 0x410   : > { %4021 = shalt.err (!%p4018_p13)
}
 0x411   : > { %s4167_s21 = smov 64   ;;  %s4168_s18 = smov 4  }
 0x412   : > { %3567 = dma.vmem_to_hbm [thread:$0]  (%p5345_p1), %s5150_s2, 1024, %s5156_s26, %s2685_s28, %s4167_s21, %s4167_s21, %s4168_s18  }
 0x413 PF: > { %p3600_p6 = scmp.ge.s32.totalorder %s4156_s22, 2  ;;  %s2716_s12 = sand.u32 1, %s4128_s15  }
 0x414   : > { %p5346_p12 = scmp.ne.s32.totalorder %s5309_s29, 0  ;;  %s2717_s1 = scalar_lea.sflag [#allocation4], %s2716_s12 }
 0x416   : > { %p3590_p7 = pnand %p3600_p6, %p5346_p12 }
 0x418   : > { %p3591_p11 = pneg %p3590_p7 }
 0x41a   : > { %4099 = dma.done.wait (%p3591_p11), %s2717_s1, 1024  }
 0x41b   : > { %4101 = vsyncadd (%p3591_p11), %s2717_s1, 4294966272  ;;  %s30_s22 = sadd.s32 1, %s4156_s22   ;;  %s5348_s11 = sld [smem:[#allocation21_spill]] }
 0x41c   : > { %p5187_p0 = scmp.ge.s32.totalorder %s30_s22, 6   ;;  %s5349_s10 = sld [smem:[#allocation22_spill]] }
 0x41d   : > { %s5350_s12 = sld [smem:[#allocation23_spill]]  ;;  %s5352_s29 = smov %s4430_s30 }
 0x41e   : > { %s5351_s20 = sld [smem:[#allocation34_spill]]  ;;  %s5359_s13 = smov %s4124_s14 }
 0x41f   : > { %s5353_s18 = sld [smem:[#allocation26_spill]]  ;;  %s5361_s15 = smov %s4132_s16 }
 0x420   : > { %s5354_s19 = sld [smem:[#allocation27_spill]]  ;;  %s5362_s16 = smov %s4136_s17 }
 0x421   : > { %s5355_s2 = sld [smem:[#allocation29_spill]]  ;;  %s5357_s30 = smov %s5348_s11 }
 0x422   : > { %s5356_s21 = sld [smem:[#allocation30_spill]]  ;;  %s5358_s11 = smov %s5380_s3 }
 0x423   : > { %s5363_s17 = smov %s5352_s29  ;;  %29 = sbr.rel (!%p5187_p0) target bundleno = 25 (0x19), region = 139 }
 0x424   : > { %s5360_s14 = smov %s5351_s20 }
 0x427   : > { %s5364_s20 = smov %s5355_s2 }
 0x428   :  { %2722 = vsyncpa [#allocation3], 1 }
 0x429   :  { %2724 = vsyncpa [#allocation3 + $0x1], 1 }
 0x42a   :  { %2725 = vsyncpa [#allocation6], 1 }
 0x42b   :  { %2727 = vsyncpa [#allocation6 + $0x1], 1 }
 0x42c   :  { %2728 = vsyncpa [#allocation9], 1 }
 0x42d   :  { %2729 = vsyncpa [#allocation12], 1 }
 0x42e   :  { %2730 = vsyncpa [#allocation4], 1 }
 0x42f   :  { %2732 = vsyncpa [#allocation4 + $0x1], 1 }

</bundles_post_ra>
